<compile_context>
chip_gen: v7x
topology: tpu7x:2x2x1
jax: 0.10.0
libtpu: 0.0.40
codegen_flags: <defaults>
</compile_context>

<pallas_src>
import functools

import jax
import jax.numpy as jnp
from jax.experimental import pallas as pl
from jax.experimental.pallas import tpu as pltpu


_SQRT1_2 = 0.7071067811865476


def _gelu_erf(y):
    # exact GELU (erf), matching torch.nn.GELU default used by timm Mlp
    return 0.5 * y * (1.0 + jax.lax.erf(y * jnp.float32(_SQRT1_2)))


_VMEM_LIMIT = None


def _vmem_limit_bytes():
    """Scoped-VMEM limit: lift v5e's 16 MiB default, stay inside v7x's 64 MiB physical."""
    global _VMEM_LIMIT
    if _VMEM_LIMIT is None:
        cap = 64 * 1024 * 1024
        try:
            info = pltpu.get_tpu_info()
            cap = int(getattr(info, "vmem_capacity_bytes", cap)) or cap
        except Exception:
            pass
        _VMEM_LIMIT = min(48 * 1024 * 1024, (cap * 3) // 4)
    return _VMEM_LIMIT


def _pick_tiles(M, N, K):
    """TPU-friendly tiles: blocks (8,128)-aligned or full-dim; tk must divide K exactly."""
    tm = M if M <= 512 else 512
    if N <= 768:
        tn = N
    else:
        tn = 512
        for cand in (768, 512, 384, 256, 128):
            if N % cand == 0:
                tn = cand
                break
    if K <= 2048:
        tk = K                      # no K grid axis, no accumulator scratch
    else:
        tk = K
        for cand in (1024, 768, 512, 256, 128):
            if K % cand == 0:
                tk = cand
                break
    return tm, tn, tk


# ---------------------------------------------------------------------------
# Tiled matmul + bias (+ activation) (+ fused residual add)
# ---------------------------------------------------------------------------
def _epilogue(y, b_ref, res_ref, activation, o_ref):
    y = y + b_ref[...].astype(jnp.float32)
    if activation == "gelu":
        y = _gelu_erf(y)
    elif activation == "tanh":
        y = jnp.tanh(y)
    if res_ref is not None:
        y = y + res_ref[...].astype(jnp.float32)
    o_ref[...] = y.astype(o_ref.dtype)


def _mm_single_kernel(x_ref, w_ref, b_ref, *rest, activation, has_residual):
    # K fits in one block: single MXU pass, no accumulator scratch, no K grid axis.
    if has_residual:
        res_ref, o_ref = rest
    else:
        res_ref, (o_ref,) = None, rest
    y = jnp.dot(x_ref[...], w_ref[...], preferred_element_type=jnp.float32)
    _epilogue(y, b_ref, res_ref, activation, o_ref)


def _mm_acc_kernel(x_ref, w_ref, b_ref, *rest, activation, has_residual):
    if has_residual:
        res_ref, o_ref, acc_ref = rest
    else:
        res_ref, (o_ref, acc_ref) = None, rest
    k = pl.program_id(2)

    @pl.when(k == 0)
    def _():
        acc_ref[...] = jnp.zeros_like(acc_ref)

    acc_ref[...] += jnp.dot(x_ref[...], w_ref[...], preferred_element_type=jnp.float32)

    @pl.when(k == pl.num_programs(2) - 1)
    def _():
        _epilogue(acc_ref[...], b_ref, res_ref, activation, o_ref)


def matmul_bias(x, w, b, *, activation="none", residual=None, out_dtype=None):
    """y = act(x @ w + b) [+ residual].  x:(M,K) w:(K,N) b:(N,) residual:(M,N)."""
    M, K = x.shape
    _, N = w.shape
    out_dtype = out_dtype or x.dtype
    tm, tn, tk = _pick_tiles(M, N, K)
    has_res = residual is not None
    b2 = b.reshape(1, N)

    cost = pl.CostEstimate(
        flops=2 * M * N * K,
        transcendentals=(M * N if activation != "none" else 0),
        bytes_accessed=int((M * K + K * N + (3 if has_res else 2) * M * N) * 2))
    vlim = _vmem_limit_bytes()

    if tk == K:
        # single K block: 2-D grid, direct write
        grid = (pl.cdiv(M, tm), pl.cdiv(N, tn))
        in_specs = [
            pl.BlockSpec((tm, K), lambda i, j: (i, 0)),
            pl.BlockSpec((K, tn), lambda i, j: (0, j)),
            pl.BlockSpec((1, tn), lambda i, j: (0, j)),
        ]
        args = [x, w, b2]
        if has_res:
            in_specs.append(pl.BlockSpec((tm, tn), lambda i, j: (i, j)))
            args.append(residual)
        return pl.pallas_call(
            functools.partial(_mm_single_kernel, activation=activation,
                              has_residual=has_res),
            grid=grid,
            out_shape=jax.ShapeDtypeStruct((M, N), out_dtype),
            in_specs=in_specs,
            out_specs=pl.BlockSpec((tm, tn), lambda i, j: (i, j)),
            compiler_params=pltpu.CompilerParams(
                dimension_semantics=("parallel", "parallel"),
                vmem_limit_bytes=vlim),
            cost_estimate=cost,
        )(*args)

    # large K: 3-D grid with fp32 VMEM accumulator
    grid = (pl.cdiv(M, tm), pl.cdiv(N, tn), K // tk)
    in_specs = [
        pl.BlockSpec((tm, tk), lambda i, j, k: (i, k)),
        pl.BlockSpec((tk, tn), lambda i, j, k: (k, j)),
        pl.BlockSpec((1, tn), lambda i, j, k: (0, j)),
    ]
    args = [x, w, b2]
    if has_res:
        in_specs.append(pl.BlockSpec((tm, tn), lambda i, j, k: (i, j)))
        args.append(residual)
    return pl.pallas_call(
        functools.partial(_mm_acc_kernel, activation=activation, has_residual=has_res),
        grid=grid,
        out_shape=jax.ShapeDtypeStruct((M, N), out_dtype),
        in_specs=in_specs,
        out_specs=pl.BlockSpec((tm, tn), lambda i, j, k: (i, j)),
        scratch_shapes=[pltpu.VMEM((tm, tn), jnp.float32)],
        compiler_params=pltpu.CompilerParams(
            dimension_semantics=("parallel", "parallel", "arbitrary"),
            vmem_limit_bytes=vlim),
        cost_estimate=cost,
    )(*args)


# ---------------------------------------------------------------------------
# Fused LayerNorm + matmul + bias (+ activation).
# The normalized row tile is computed once (j == 0) into a VMEM scratch and reused for
# every N tile of the same row block (j axis must be sequential -> "arbitrary").
# ---------------------------------------------------------------------------
def _ln_mm_kernel(x_ref, g_ref, be_ref, w_ref, b_ref, o_ref, h_ref, *, eps, activation):
    @pl.when(pl.program_id(1) == 0)
    def _():
        x = x_ref[...].astype(jnp.float32)
        mean = jnp.mean(x, axis=-1, keepdims=True)
        xc = x - mean
        var = jnp.mean(xc * xc, axis=-1, keepdims=True)
        h = xc * jax.lax.rsqrt(var + eps)
        h = h * g_ref[...].astype(jnp.float32) + be_ref[...].astype(jnp.float32)
        h_ref[...] = h.astype(h_ref.dtype)

    y = jnp.dot(h_ref[...], w_ref[...], preferred_element_type=jnp.float32)
    y = y + b_ref[...].astype(jnp.float32)
    if activation == "gelu":
        y = _gelu_erf(y)
    elif activation == "tanh":
        y = jnp.tanh(y)
    o_ref[...] = y.astype(o_ref.dtype)


def ln_matmul_bias(x, gamma, beta, w, b, *, activation="none", eps=1e-6, out_dtype=None):
    """y = act(LayerNorm(x) @ w + b).  x carries the full K dim (K = embed dim) per block."""
    M, K = x.shape
    _, N = w.shape
    out_dtype = out_dtype or x.dtype
    tm, tn, _ = _pick_tiles(M, N, K)
    grid = (pl.cdiv(M, tm), pl.cdiv(N, tn))

    return pl.pallas_call(
        functools.partial(_ln_mm_kernel, eps=eps, activation=activation),
        grid=grid,
        out_shape=jax.ShapeDtypeStruct((M, N), out_dtype),
        in_specs=[
            pl.BlockSpec((tm, K), lambda i, j: (i, 0)),
            pl.BlockSpec((1, K), lambda i, j: (0, 0)),
            pl.BlockSpec((1, K), lambda i, j: (0, 0)),
            pl.BlockSpec((K, tn), lambda i, j: (0, j)),
            pl.BlockSpec((1, tn), lambda i, j: (0, j)),
        ],
        out_specs=pl.BlockSpec((tm, tn), lambda i, j: (i, j)),
        scratch_shapes=[pltpu.VMEM((tm, K), jnp.bfloat16)],   # cached normalized rows
        compiler_params=pltpu.CompilerParams(
            dimension_semantics=("parallel", "arbitrary"),
            vmem_limit_bytes=_vmem_limit_bytes()),
        cost_estimate=pl.CostEstimate(
            flops=2 * M * N * K,
            transcendentals=(M * N if activation != "none" else 0) + M * K,
            bytes_accessed=int((M * K + K * N + M * N) * 2)),
    )(x, gamma.reshape(1, K), beta.reshape(1, K), w, b.reshape(1, N))


# ---------------------------------------------------------------------------
# Multi-head attention.  Heads are processed in 128-lane-aligned groups (pairs for Dh=64);
# q/k/v are three aligned BlockSpec views of the natural (B, T, 3D) qkv slab, the output is
# written as full-width (T, group) blocks.  Grid (B, n_groups) exposes work to both v7x TCs.
# ---------------------------------------------------------------------------
def _softmax_av(s, v, kmask, dtype):
    if kmask is not None:
        s = jnp.where(kmask, jnp.float32(-1e30), s)
    m = jnp.max(s, axis=-1, keepdims=True)
    p = jnp.exp((s - m).astype(jnp.bfloat16))           # bf16 EUP path (s - m <= 0)
    denom = jnp.sum(p.astype(jnp.float32), axis=-1, keepdims=True)
    o = jnp.dot(p.astype(dtype), v, preferred_element_type=jnp.float32)   # (T, Dh)
    return o * pl.reciprocal(denom, approx=True)        # normalize the small output, EUP recip


def _attn_group_kernel(q_ref, k_ref, v_ref, o_ref, *, hpg, dh, scale, t_real):
    # q_ref/k_ref/v_ref/o_ref: (1, T, hpg*dh) with hpg*dh a multiple of 128
    T = q_ref.shape[1]
    kmask = None
    if t_real < T:
        kmask = jax.lax.broadcasted_iota(jnp.int32, (1, T), 1) >= t_real
    outs = []
    for h in range(hpg):                                 # unrolled at trace time
        lo, hi = h * dh, (h + 1) * dh
        q = (q_ref[0, :, lo:hi].astype(jnp.float32) * scale).astype(q_ref.dtype)
        k = k_ref[0, :, lo:hi]
        v = v_ref[0, :, lo:hi]
        s = jax.lax.dot_general(q, k, (((1,), (1,)), ((), ())),
                                preferred_element_type=jnp.float32)       # (T, T)
        outs.append(_softmax_av(s, v, kmask, v.dtype))
    o_ref[0] = jnp.concatenate(outs, axis=-1).astype(o_ref.dtype)         # full-width store


def _attn_full_kernel(qkv_ref, o_ref, *, heads, dim, scale, t_real):
    # Fallback (only when D is not a multiple of 128): one batch per step, all heads.
    T = qkv_ref.shape[1]
    dh = dim // heads
    kmask = None
    if t_real < T:
        kmask = jax.lax.broadcasted_iota(jnp.int32, (1, T), 1) >= t_real
    outs = []
    for h in range(heads):
        qs, ks, vs = h * dh, dim + h * dh, 2 * dim + h * dh
        q = (qkv_ref[0, :, qs:qs + dh].astype(jnp.float32) * scale).astype(qkv_ref.dtype)
        k = qkv_ref[0, :, ks:ks + dh]
        v = qkv_ref[0, :, vs:vs + dh]
        s = jax.lax.dot_general(q, k, (((1,), (1,)), ((), ())),
                                preferred_element_type=jnp.float32)
        outs.append(_softmax_av(s, v, kmask, v.dtype))
    o_ref[0] = jnp.concatenate(outs, axis=-1).astype(o_ref.dtype)


def mha_attention(qkv, *, heads, scale, t_real):
    """qkv: (B, T, 3D) natural layout -> (B, T, D).  Pad keys (>= t_real) are masked."""
    B, T, threeD = qkv.shape
    D = threeD // 3
    dh = D // heads

    # smallest head group whose lane width is a multiple of 128 (pairs for Dh=64)
    hpg = None
    for cand in range(1, heads + 1):
        if heads % cand == 0 and (cand * dh) % 128 == 0:
            hpg = cand
            break

    cost = pl.CostEstimate(
        flops=4 * B * heads * T * T * dh,
        transcendentals=B * heads * T * T,
        bytes_accessed=int((B * T * threeD + B * T * D) * 2))
    vlim = _vmem_limit_bytes()

    if hpg is not None:
        gw = hpg * dh
        n_groups = heads // hpg
        return pl.pallas_call(
            functools.partial(_attn_group_kernel, hpg=hpg, dh=dh, scale=scale,
                              t_real=t_real),
            grid=(B, n_groups),
            out_shape=jax.ShapeDtypeStruct((B, T, D), qkv.dtype),
            in_specs=[
                pl.BlockSpec((1, T, gw), lambda b, g: (b, 0, g)),                  # q view
                pl.BlockSpec((1, T, gw), lambda b, g: (b, 0, n_groups + g)),       # k view
                pl.BlockSpec((1, T, gw), lambda b, g: (b, 0, 2 * n_groups + g)),   # v view
            ],
            out_specs=pl.BlockSpec((1, T, gw), lambda b, g: (b, 0, g)),
            compiler_params=pltpu.CompilerParams(
                dimension_semantics=("parallel", "parallel"),
                vmem_limit_bytes=vlim),
            cost_estimate=cost,
        )(qkv, qkv, qkv)

    return pl.pallas_call(
        functools.partial(_attn_full_kernel, heads=heads, dim=D, scale=scale,
                          t_real=t_real),
        grid=(B,),
        out_shape=jax.ShapeDtypeStruct((B, T, D), qkv.dtype),
        in_specs=[pl.BlockSpec((1, T, threeD), lambda b: (b, 0, 0))],
        out_specs=pl.BlockSpec((1, T, D), lambda b: (b, 0, 0)),
        compiler_params=pltpu.CompilerParams(
            dimension_semantics=("parallel",), vmem_limit_bytes=vlim),
        cost_estimate=cost,
    )(qkv)


# ---------------------------------------------------------------------------
# ViT forward (timm vision_transformer semantics, head = Identity)
# ---------------------------------------------------------------------------
def vit2_forward(params, x, *, patch, heads):
    """x: (B, C, H, W) float32 (NCHW, as in PyTorch). Returns (B, embed_dim) float32."""
    B, C, H, W = x.shape
    nH, nW = H // patch, W // patch
    nP = nH * nW
    T = nP + 1
    T_pad = ((T + 7) // 8) * 8          # sublane-align the token axis
    D = params["cls_token"].shape[-1]
    Dh = D // heads
    scale = Dh ** -0.5
    cdt = jnp.bfloat16

    # --- patch_embed: Conv2d(k=p, s=p) as im2col + tiled matmul ---
    xp = x.reshape(B, C, nH, patch, nW, patch).transpose(0, 2, 4, 1, 3, 5)
    xp = xp.reshape(B * nP, C * patch * patch).astype(cdt)
    tokens = matmul_bias(xp, params["patch_w"], params["patch_b"], out_dtype=cdt)
    tokens = tokens.reshape(B, nP, D)

    # --- cls concat + pos embed add (folded into one XLA pass; no (B*nP,D) broadcast) ---
    cls = jnp.broadcast_to(params["cls_token"].astype(cdt), (B, 1, D))
    xseq = jnp.concatenate([cls, tokens], axis=1) + params["pos_embed"].astype(cdt)
    if T_pad > T:
        xseq = jnp.pad(xseq, ((0, 0), (0, T_pad - T), (0, 0)))   # zero pad rows
    x2 = xseq.reshape(B * T_pad, D)
    # pos_drop is identity in eval mode

    # --- transformer blocks ---
    for blk in params["blocks"]:
        # attention branch: LN fused into qkv matmul; residual fused into proj matmul
        qkv = ln_matmul_bias(x2, blk["ln1_w"], blk["ln1_b"],
                             blk["qkv_w"], blk["qkv_b"])                 # (B*T_pad, 3D)
        ao = mha_attention(qkv.reshape(B, T_pad, 3 * D),
                           heads=heads, scale=scale, t_real=T)
        x2 = matmul_bias(ao.reshape(B * T_pad, D), blk["proj_w"], blk["proj_b"],
                         residual=x2)                                    # x2 + proj(attn)

        # MLP branch: LN fused into fc1 (+GELU); residual fused into fc2
        h = ln_matmul_bias(x2, blk["ln2_w"], blk["ln2_b"],
                           blk["fc1_w"], blk["fc1_b"], activation="gelu")
        x2 = matmul_bias(h, blk["fc2_w"], blk["fc2_b"], residual=x2)     # x2 + mlp(...)

    # --- final norm + pre_logits (Linear + Tanh for *_in21k models) on the cls row only ---
    cls_feat = x2.reshape(B, T_pad, D)[:, 0]                             # (B, D)
    out = ln_matmul_bias(cls_feat, params["norm_w"], params["norm_b"],
                         params["pre_w"], params["pre_b"],
                         activation="tanh", out_dtype=jnp.float32)
    return out  # head is Identity in ViT2


# ---------------------------------------------------------------------------
# Deterministic parameter construction (synthetic weights).
# TODO(synk): loading the pretrained timm checkpoint is host I/O outside kernel scope;
# a torch checkpoint converts once at load time (conv weight (D,C,p,p)->reshape(D,-1).T,
# Linear weight (out,in)->.T), stored bf16 in (in_features, out_features) layout.
# ---------------------------------------------------------------------------
def make_params(key, *, channels, patch, embed_dim, depth, heads, mlp_ratio, n_patches):
    D = embed_dim
    hidden = int(D * mlp_ratio)
    T = n_patches + 1
    keys = jax.random.split(key, 6 + depth)

    def nrm(k, shape, dtype=jnp.bfloat16):
        return (0.02 * jax.random.normal(k, shape)).astype(dtype)

    params = {
        "patch_w": nrm(keys[0], (channels * patch * patch, D)),
        "patch_b": jnp.zeros((D,), jnp.float32),
        "cls_token": nrm(keys[1], (1, 1, D), jnp.float32),
        "pos_embed": nrm(keys[2], (1, T, D), jnp.float32),
        "norm_w": jnp.ones((D,), jnp.float32),
        "norm_b": jnp.zeros((D,), jnp.float32),
        "pre_w": nrm(keys[3], (D, D)),
        "pre_b": jnp.zeros((D,), jnp.float32),
        "blocks": [],
    }
    for d in range(depth):
        bk = jax.random.split(keys[6 + d], 4)
        params["blocks"].append({
            "ln1_w": jnp.ones((D,), jnp.float32), "ln1_b": jnp.zeros((D,), jnp.float32),
            "qkv_w": nrm(bk[0], (D, 3 * D)),      "qkv_b": jnp.zeros((3 * D,), jnp.float32),
            "proj_w": nrm(bk[1], (D, D)),         "proj_b": jnp.zeros((D,), jnp.float32),
            "ln2_w": jnp.ones((D,), jnp.float32), "ln2_b": jnp.zeros((D,), jnp.float32),
            "fc1_w": nrm(bk[2], (D, hidden)),     "fc1_b": jnp.zeros((hidden,), jnp.float32),
            "fc2_w": nrm(bk[3], (hidden, D)),     "fc2_b": jnp.zeros((D,), jnp.float32),
        })
    return params


if __name__ == "__main__":
    # Small ViT configuration consistent with the module's forward.  Dh=64 (like ViT-B/L)
    # so the 128-lane head-pair attention path is exercised:
    # B=2, C=3, 16x16 image, patch=8 -> 4 patches (+1 cls, padded to 8), embed=128, 2 heads.
    B, C, H, W = 2, 3, 16, 16
    PATCH, EMBED, DEPTH, HEADS, MLP_RATIO = 8, 128, 2, 2, 4.0
    N_PATCHES = (H // PATCH) * (W // PATCH)

    key = jax.random.PRNGKey(0)
    k_params, k_x = jax.random.split(key)
    params = make_params(k_params, channels=C, patch=PATCH, embed_dim=EMBED,
                         depth=DEPTH, heads=HEADS, mlp_ratio=MLP_RATIO,
                         n_patches=N_PATCHES)
    x = jax.random.normal(k_x, (B, C, H, W), dtype=jnp.float32)

    fwd = jax.jit(functools.partial(vit2_forward, patch=PATCH, heads=HEADS))
    feats = fwd(params, x)
    feats = jax.block_until_ready(feats)
    assert feats.shape == (B, EMBED)
    assert bool(jnp.all(jnp.isfinite(feats)))
    print("KERNEL_OK")
</pallas_src>

<mosaic_0001>
module attributes {stable_mosaic.version = 11 : i64} {
  func.func @_mm_single_kernel(%arg0: i32, %arg1: i32, %arg2: memref<8x192xbf16, #tpu.memory_space<vmem>>, %arg3: memref<192x128xbf16, #tpu.memory_space<vmem>>, %arg4: memref<1x128xf32, #tpu.memory_space<vmem>>, %arg5: memref<8x128xbf16, #tpu.memory_space<vmem>>) attributes {dimension_semantics = [#tpu.dimension_semantics<parallel>, #tpu.dimension_semantics<parallel>], iteration_bounds = array<i64: 1, 1>, scalar_prefetch = 0 : i64, scratch_operands = 0 : i64, tpu.core_type = #tpu.core_type<tc>, window_params = [{transform_indices = @transform_0, window_bounds = array<i64: 8, 192>}, {transform_indices = @transform_1, window_bounds = array<i64: 192, 128>}, {transform_indices = @transform_2, window_bounds = array<i64: 1, 128>}, {transform_indices = @transform_3, window_bounds = array<i64: 8, 128>}]} {
    %c0 = arith.constant 0 : index
    %c0_0 = arith.constant 0 : index
    %0 = vector.load %arg2[%c0, %c0_0] : memref<8x192xbf16, #tpu.memory_space<vmem>>, vector<8x192xbf16>
    %c0_1 = arith.constant 0 : index
    %c0_2 = arith.constant 0 : index
    %1 = vector.load %arg3[%c0_1, %c0_2] : memref<192x128xbf16, #tpu.memory_space<vmem>>, vector<192x128xbf16>
    %cst = arith.constant dense<0.000000e+00> : vector<8x128xf32>
    %2 = tpu.matmul %0, %1, %cst {dimension_numbers = #tpu.dot_dimension_numbers<[1], [0], [0], [1], [0, 0, 1, 1], [], []>} : vector<8x192xbf16>, vector<192x128xbf16>, vector<8x128xf32> -> vector<8x128xf32>
    %c0_3 = arith.constant 0 : index
    %c0_4 = arith.constant 0 : index
    %3 = vector.load %arg4[%c0_3, %c0_4] : memref<1x128xf32, #tpu.memory_space<vmem>>, vector<1x128xf32>
    %4 = vector.broadcast %3 : vector<1x128xf32> to vector<8x128xf32>
    %5 = arith.addf %2, %4 : vector<8x128xf32>
    %6 = arith.truncf %5 : vector<8x128xf32> to vector<8x128xbf16>
    %c0_5 = arith.constant 0 : index
    %c0_6 = arith.constant 0 : index
    %7 = vector.load %arg5[%c0_5, %c0_6] : memref<8x128xbf16, #tpu.memory_space<vmem>>, vector<8x128xbf16>
    tpu.vector_store %arg5[%c0_5, %c0_6], %6 {strides = array<i32>} : memref<8x128xbf16, #tpu.memory_space<vmem>>, vector<8x128xbf16>,
    return
  }
  func.func @transform_0(%arg0: i32, %arg1: i32) -> (i32, i32) {
    %c0_i32 = arith.constant 0 : i32
    %c0_i32_0 = arith.constant 0 : i32
    return %arg0, %c0_i32 : i32, i32
  }
  func.func @transform_1(%arg0: i32, %arg1: i32) -> (i32, i32) {
    %c0_i32 = arith.constant 0 : i32
    %c0_i32_0 = arith.constant 0 : i32
    return %c0_i32, %arg1 : i32, i32
  }
  func.func @transform_2(%arg0: i32, %arg1: i32) -> (i32, i32) {
    %c0_i32 = arith.constant 0 : i32
    %c0_i32_0 = arith.constant 0 : i32
    return %c0_i32, %arg1 : i32, i32
  }
  func.func @transform_3(%arg0: i32, %arg1: i32) -> (i32, i32) {
    %c0_i32 = arith.constant 0 : i32
    return %arg0, %arg1 : i32, i32
  }
}

module attributes {stable_mosaic.version = 11 : i64} {
  func.func @_ln_mm_kernel(%arg0: i32, %arg1: i32, %arg2: memref<16x128xbf16, #tpu.memory_space<vmem>>, %arg3: memref<1x128xf32, #tpu.memory_space<vmem>>, %arg4: memref<1x128xf32, #tpu.memory_space<vmem>>, %arg5: memref<128x384xbf16, #tpu.memory_space<vmem>>, %arg6: memref<1x384xf32, #tpu.memory_space<vmem>>, %arg7: memref<16x384xbf16, #tpu.memory_space<vmem>>, %arg8: memref<16x128xbf16, #tpu.memory_space<vmem>>) attributes {dimension_semantics = [#tpu.dimension_semantics<parallel>, #tpu.dimension_semantics<arbitrary>], iteration_bounds = array<i64: 1, 1>, scalar_prefetch = 0 : i64, scratch_operands = 1 : i64, tpu.core_type = #tpu.core_type<tc>, window_params = [{transform_indices = @transform_0, window_bounds = array<i64: 16, 128>}, {pipeline_mode = #tpu.pipeline_mode<synchronous>, transform_indices = @transform_1, window_bounds = array<i64: 1, 128>}, {pipeline_mode = #tpu.pipeline_mode<synchronous>, transform_indices = @transform_2, window_bounds = array<i64: 1, 128>}, {transform_indices = @transform_3, window_bounds = array<i64: 128, 384>}, {transform_indices = @transform_4, window_bounds = array<i64: 1, 384>}, {transform_indices = @transform_5, window_bounds = array<i64: 16, 384>}]} {
    %c0_i32 = arith.constant 0 : i32
    %0 = arith.cmpi eq, %arg1, %c0_i32 : i32
    %1 = arith.extui %0 : i1 to i32
    %c0_i32_0 = arith.constant 0 : i32
    %2 = arith.cmpi ne, %1, %c0_i32_0 : i32
    scf.if %2 {
      %c0_8 = arith.constant 0 : index
      %c0_9 = arith.constant 0 : index
      %11 = vector.load %arg2[%c0_8, %c0_9] : memref<16x128xbf16, #tpu.memory_space<vmem>>, vector<16x128xbf16>
      %12 = arith.extf %11 : vector<16x128xbf16> to vector<16x128xf32>
      %cst_10 = arith.constant dense<0.000000e+00> : vector<16xf32>
      %13 = vector.multi_reduction <add>, %12, %cst_10 [1] : vector<16x128xf32> to vector<16xf32>
      %14 = vector.shape_cast %13 : vector<16xf32> to vector<16x1xf32>
      %cst_11 = arith.constant 1.280000e+02 : f32
      %15 = vector.broadcast %cst_11 : f32 to vector<16x1xf32>
      %16 = arith.divf %14, %15 : vector<16x1xf32>
      %17 = vector.broadcast %16 : vector<16x1xf32> to vector<16x128xf32>
      %18 = arith.subf %12, %17 : vector<16x128xf32>
      %19 = arith.mulf %18, %18 : vector<16x128xf32>
      %cst_12 = arith.constant dense<0.000000e+00> : vector<16xf32>
      %20 = vector.multi_reduction <add>, %19, %cst_12 [1] : vector<16x128xf32> to vector<16xf32>
      %21 = vector.shape_cast %20 : vector<16xf32> to vector<16x1xf32>
      %cst_13 = arith.constant 1.280000e+02 : f32
      %22 = vector.broadcast %cst_13 : f32 to vector<16x1xf32>
      %23 = arith.divf %21, %22 : vector<16x1xf32>
      %cst_14 = arith.constant 9.99999997E-7 : f32
      %24 = vector.broadcast %cst_14 : f32 to vector<16x1xf32>
      %25 = arith.addf %23, %24 : vector<16x1xf32>
      %26 = math.rsqrt %25 : vector<16x1xf32>
      %27 = vector.broadcast %26 : vector<16x1xf32> to vector<16x128xf32>
      %28 = arith.mulf %18, %27 : vector<16x128xf32>
      %c0_15 = arith.constant 0 : index
      %c0_16 = arith.constant 0 : index
      %29 = vector.load %arg3[%c0_15, %c0_16] : memref<1x128xf32, #tpu.memory_space<vmem>>, vector<1x128xf32>
      %30 = vector.broadcast %29 : vector<1x128xf32> to vector<16x128xf32>
      %31 = arith.mulf %28, %30 : vector<16x128xf32>
      %c0_17 = arith.constant 0 : index
      %c0_18 = arith.constant 0 : index
      %32 = vector.load %arg4[%c0_17, %c0_18] : memref<1x128xf32, #tpu.memory_space<vmem>>, vector<1x128xf32>
      %33 = vector.broadcast %32 : vector<1x128xf32> to vector<16x128xf32>
      %34 = arith.addf %31, %33 : vector<16x128xf32>
      %35 = arith.truncf %34 : vector<16x128xf32> to vector<16x128xbf16>
      %c0_19 = arith.constant 0 : index
      %c0_20 = arith.constant 0 : index
      %36 = vector.load %arg8[%c0_19, %c0_20] : memref<16x128xbf16, #tpu.memory_space<vmem>>, vector<16x128xbf16>
      tpu.vector_store %arg8[%c0_19, %c0_20], %35 {strides = array<i32>} : memref<16x128xbf16, #tpu.memory_space<vmem>>, vector<16x128xbf16>,
    } else {
    }
    %c0 = arith.constant 0 : index
    %c0_1 = arith.constant 0 : index
    %3 = vector.load %arg8[%c0, %c0_1] : memref<16x128xbf16, #tpu.memory_space<vmem>>, vector<16x128xbf16>
    %c0_2 = arith.constant 0 : index
    %c0_3 = arith.constant 0 : index
    %4 = vector.load %arg5[%c0_2, %c0_3] : memref<128x384xbf16, #tpu.memory_space<vmem>>, vector<128x384xbf16>
    %cst = arith.constant dense<0.000000e+00> : vector<16x384xf32>
    %5 = tpu.matmul %3, %4, %cst {dimension_numbers = #tpu.dot_dimension_numbers<[1], [0], [0], [1], [0, 0, 1, 1], [], []>} : vector<16x128xbf16>, vector<128x384xbf16>, vector<16x384xf32> -> vector<16x384xf32>
    %c0_4 = arith.constant 0 : index
    %c0_5 = arith.constant 0 : index
    %6 = vector.load %arg6[%c0_4, %c0_5] : memref<1x384xf32, #tpu.memory_space<vmem>>, vector<1x384xf32>
    %7 = vector.broadcast %6 : vector<1x384xf32> to vector<16x384xf32>
    %8 = arith.addf %5, %7 : vector<16x384xf32>
    %9 = arith.truncf %8 : vector<16x384xf32> to vector<16x384xbf16>
    %c0_6 = arith.constant 0 : index
    %c0_7 = arith.constant 0 : index
    %10 = vector.load %arg7[%c0_6, %c0_7] : memref<16x384xbf16, #tpu.memory_space<vmem>>, vector<16x384xbf16>
    tpu.vector_store %arg7[%c0_6, %c0_7], %9 {strides = array<i32>} : memref<16x384xbf16, #tpu.memory_space<vmem>>, vector<16x384xbf16>,
    return
  }
  func.func @transform_0(%arg0: i32, %arg1: i32) -> (i32, i32) {
    %c0_i32 = arith.constant 0 : i32
    %c0_i32_0 = arith.constant 0 : i32
    return %arg0, %c0_i32 : i32, i32
  }
  func.func @transform_1(%arg0: i32, %arg1: i32) -> (i32, i32) {
    %c0_i32 = arith.constant 0 : i32
    %c0_i32_0 = arith.constant 0 : i32
    %c0_i32_1 = arith.constant 0 : i32
    return %c0_i32, %c0_i32_0 : i32, i32
  }
  func.func @transform_2(%arg0: i32, %arg1: i32) -> (i32, i32) {
    %c0_i32 = arith.constant 0 : i32
    %c0_i32_0 = arith.constant 0 : i32
    %c0_i32_1 = arith.constant 0 : i32
    return %c0_i32, %c0_i32_0 : i32, i32
  }
  func.func @transform_3(%arg0: i32, %arg1: i32) -> (i32, i32) {
    %c0_i32 = arith.constant 0 : i32
    %c0_i32_0 = arith.constant 0 : i32
    return %c0_i32, %arg1 : i32, i32
  }
  func.func @transform_4(%arg0: i32, %arg1: i32) -> (i32, i32) {
    %c0_i32 = arith.constant 0 : i32
    %c0_i32_0 = arith.constant 0 : i32
    return %c0_i32, %arg1 : i32, i32
  }
  func.func @transform_5(%arg0: i32, %arg1: i32) -> (i32, i32) {
    %c0_i32 = arith.constant 0 : i32
    return %arg0, %arg1 : i32, i32
  }
}

module attributes {stable_mosaic.version = 11 : i64} {
  func.func @_mm_single_kernel(%arg0: i32, %arg1: i32, %arg2: memref<16x128xbf16, #tpu.memory_space<vmem>>, %arg3: memref<128x128xbf16, #tpu.memory_space<vmem>>, %arg4: memref<1x128xf32, #tpu.memory_space<vmem>>, %arg5: memref<16x128xbf16, #tpu.memory_space<vmem>>, %arg6: memref<16x128xbf16, #tpu.memory_space<vmem>>) attributes {dimension_semantics = [#tpu.dimension_semantics<parallel>, #tpu.dimension_semantics<parallel>], iteration_bounds = array<i64: 1, 1>, scalar_prefetch = 0 : i64, scratch_operands = 0 : i64, tpu.core_type = #tpu.core_type<tc>, window_params = [{transform_indices = @transform_0, window_bounds = array<i64: 16, 128>}, {transform_indices = @transform_1, window_bounds = array<i64: 128, 128>}, {transform_indices = @transform_2, window_bounds = array<i64: 1, 128>}, {transform_indices = @transform_3, window_bounds = array<i64: 16, 128>}, {transform_indices = @transform_4, window_bounds = array<i64: 16, 128>}]} {
    %c0 = arith.constant 0 : index
    %c0_0 = arith.constant 0 : index
    %0 = vector.load %arg2[%c0, %c0_0] : memref<16x128xbf16, #tpu.memory_space<vmem>>, vector<16x128xbf16>
    %c0_1 = arith.constant 0 : index
    %c0_2 = arith.constant 0 : index
    %1 = vector.load %arg3[%c0_1, %c0_2] : memref<128x128xbf16, #tpu.memory_space<vmem>>, vector<128x128xbf16>
    %cst = arith.constant dense<0.000000e+00> : vector<16x128xf32>
    %2 = tpu.matmul %0, %1, %cst {dimension_numbers = #tpu.dot_dimension_numbers<[1], [0], [0], [1], [0, 0, 1, 1], [], []>} : vector<16x128xbf16>, vector<128x128xbf16>, vector<16x128xf32> -> vector<16x128xf32>
    %c0_3 = arith.constant 0 : index
    %c0_4 = arith.constant 0 : index
    %3 = vector.load %arg4[%c0_3, %c0_4] : memref<1x128xf32, #tpu.memory_space<vmem>>, vector<1x128xf32>
    %4 = vector.broadcast %3 : vector<1x128xf32> to vector<16x128xf32>
    %5 = arith.addf %2, %4 : vector<16x128xf32>
    %c0_5 = arith.constant 0 : index
    %c0_6 = arith.constant 0 : index
    %6 = vector.load %arg5[%c0_5, %c0_6] : memref<16x128xbf16, #tpu.memory_space<vmem>>, vector<16x128xbf16>
    %7 = arith.extf %6 : vector<16x128xbf16> to vector<16x128xf32>
    %8 = arith.addf %5, %7 : vector<16x128xf32>
    %9 = arith.truncf %8 : vector<16x128xf32> to vector<16x128xbf16>
    %c0_7 = arith.constant 0 : index
    %c0_8 = arith.constant 0 : index
    %10 = vector.load %arg6[%c0_7, %c0_8] : memref<16x128xbf16, #tpu.memory_space<vmem>>, vector<16x128xbf16>
    tpu.vector_store %arg6[%c0_7, %c0_8], %9 {strides = array<i32>} : memref<16x128xbf16, #tpu.memory_space<vmem>>, vector<16x128xbf16>,
    return
  }
  func.func @transform_0(%arg0: i32, %arg1: i32) -> (i32, i32) {
    %c0_i32 = arith.constant 0 : i32
    %c0_i32_0 = arith.constant 0 : i32
    return %arg0, %c0_i32 : i32, i32
  }
  func.func @transform_1(%arg0: i32, %arg1: i32) -> (i32, i32) {
    %c0_i32 = arith.constant 0 : i32
    %c0_i32_0 = arith.constant 0 : i32
    return %c0_i32, %arg1 : i32, i32
  }
  func.func @transform_2(%arg0: i32, %arg1: i32) -> (i32, i32) {
    %c0_i32 = arith.constant 0 : i32
    %c0_i32_0 = arith.constant 0 : i32
    return %c0_i32, %arg1 : i32, i32
  }
  func.func @transform_3(%arg0: i32, %arg1: i32) -> (i32, i32) {
    %c0_i32 = arith.constant 0 : i32
    return %arg0, %arg1 : i32, i32
  }
  func.func @transform_4(%arg0: i32, %arg1: i32) -> (i32, i32) {
    %c0_i32 = arith.constant 0 : i32
    return %arg0, %arg1 : i32, i32
  }
}

module attributes {stable_mosaic.version = 11 : i64} {
  func.func @_attn_group_kernel(%arg0: i32, %arg1: i32, %arg2: memref<1x8x128xbf16, #tpu.memory_space<vmem>>, %arg3: memref<1x8x128xbf16, #tpu.memory_space<vmem>>, %arg4: memref<1x8x128xbf16, #tpu.memory_space<vmem>>, %arg5: memref<1x8x128xbf16, #tpu.memory_space<vmem>>) attributes {dimension_semantics = [#tpu.dimension_semantics<parallel>, #tpu.dimension_semantics<parallel>], iteration_bounds = array<i64: 2, 1>, scalar_prefetch = 0 : i64, scratch_operands = 0 : i64, tpu.core_type = #tpu.core_type<tc>, window_params = [{transform_indices = @transform_0, window_bounds = array<i64: 1, 8, 128>}, {transform_indices = @transform_1, window_bounds = array<i64: 1, 8, 128>}, {transform_indices = @transform_2, window_bounds = array<i64: 1, 8, 128>}, {transform_indices = @transform_3, window_bounds = array<i64: 1, 8, 128>}]} {
    %0 = tpu.iota {dimensions = array<i32: 1>} : vector<1x8xi32>
    %c5_i32 = arith.constant 5 : i32
    %1 = vector.broadcast %c5_i32 : i32 to vector<1x8xi32>
    %2 = arith.cmpi sge, %0, %1 : vector<1x8xi32>
    %c0 = arith.constant 0 : index
    %c0_0 = arith.constant 0 : index
    %c0_1 = arith.constant 0 : index
    %3 = vector.load %arg2[%c0, %c0_0, %c0_1] : memref<1x8x128xbf16, #tpu.memory_space<vmem>>, vector<1x8x64xbf16>
    %4 = vector.shape_cast %3 : vector<1x8x64xbf16> to vector<8x64xbf16>
    %5 = arith.extf %4 : vector<8x64xbf16> to vector<8x64xf32>
    %cst = arith.constant 1.250000e-01 : f32
    %6 = vector.broadcast %cst : f32 to vector<8x64xf32>
    %7 = arith.mulf %5, %6 : vector<8x64xf32>
    %8 = arith.truncf %7 : vector<8x64xf32> to vector<8x64xbf16>
    %c0_2 = arith.constant 0 : index
    %c0_3 = arith.constant 0 : index
    %c0_4 = arith.constant 0 : index
    %9 = vector.load %arg3[%c0_2, %c0_3, %c0_4] : memref<1x8x128xbf16, #tpu.memory_space<vmem>>, vector<1x8x64xbf16>
    %10 = vector.shape_cast %9 : vector<1x8x64xbf16> to vector<8x64xbf16>
    %c0_5 = arith.constant 0 : index
    %c0_6 = arith.constant 0 : index
    %c0_7 = arith.constant 0 : index
    %11 = vector.load %arg4[%c0_5, %c0_6, %c0_7] : memref<1x8x128xbf16, #tpu.memory_space<vmem>>, vector<1x8x64xbf16>
    %12 = vector.shape_cast %11 : vector<1x8x64xbf16> to vector<8x64xbf16>
    %cst_8 = arith.constant dense<0.000000e+00> : vector<8x8xf32>
    %13 = tpu.matmul %8, %10, %cst_8 {dimension_numbers = #tpu.dot_dimension_numbers<[1], [1], [0], [0], [0, 0, 1, 0], [], []>} : vector<8x64xbf16>, vector<8x64xbf16>, vector<8x8xf32> -> vector<8x8xf32>
    %cst_9 = arith.constant -1.000000e+30 : f32
    %14 = vector.shape_cast %2 : vector<1x8xi1> to vector<1x8xi1>
    %15 = vector.broadcast %14 : vector<1x8xi1> to vector<8x8xi1>
    %16 = vector.broadcast %cst_9 : f32 to vector<8x8xf32>
    %17 = arith.select %15, %16, %13 : vector<8x8xi1>, vector<8x8xf32>
    %cst_10 = arith.constant dense<0xFF800000> : vector<8xf32>
    %18 = vector.multi_reduction <maximumf>, %17, %cst_10 [1] : vector<8x8xf32> to vector<8xf32>
    %19 = vector.shape_cast %18 : vector<8xf32> to vector<8x1xf32>
    %20 = vector.broadcast %19 : vector<8x1xf32> to vector<8x8xf32>
    %21 = arith.subf %17, %20 : vector<8x8xf32>
    %22 = arith.truncf %21 : vector<8x8xf32> to vector<8x8xbf16>
    %23 = math.exp %22 : vector<8x8xbf16>
    %24 = arith.extf %23 : vector<8x8xbf16> to vector<8x8xf32>
    %cst_11 = arith.constant dense<0.000000e+00> : vector<8xf32>
    %25 = vector.multi_reduction <add>, %24, %cst_11 [1] : vector<8x8xf32> to vector<8xf32>
    %26 = vector.shape_cast %25 : vector<8xf32> to vector<8x1xf32>
    %cst_12 = arith.constant dense<0.000000e+00> : vector<8x64xf32>
    %27 = tpu.matmul %23, %12, %cst_12 {dimension_numbers = #tpu.dot_dimension_numbers<[1], [0], [0], [1], [0, 0, 1, 1], [], []>} : vector<8x8xbf16>, vector<8x64xbf16>, vector<8x64xf32> -> vector<8x64xf32>
    %28 = tpu.reciprocal %26 {approx = true} : vector<8x1xf32> -> vector<8x1xf32>
    %29 = vector.broadcast %28 : vector<8x1xf32> to vector<8x64xf32>
    %30 = arith.mulf %27, %29 : vector<8x64xf32>
    %c0_13 = arith.constant 0 : index
    %c0_14 = arith.constant 0 : index
    %c64 = arith.constant 64 : index
    %31 = vector.load %arg2[%c0_13, %c0_14, %c64] : memref<1x8x128xbf16, #tpu.memory_space<vmem>>, vector<1x8x64xbf16>
    %32 = vector.shape_cast %31 : vector<1x8x64xbf16> to vector<8x64xbf16>
    %33 = arith.extf %32 : vector<8x64xbf16> to vector<8x64xf32>
    %cst_15 = arith.constant 1.250000e-01 : f32
    %34 = vector.broadcast %cst_15 : f32 to vector<8x64xf32>
    %35 = arith.mulf %33, %34 : vector<8x64xf32>
    %36 = arith.truncf %35 : vector<8x64xf32> to vector<8x64xbf16>
    %c0_16 = arith.constant 0 : index
    %c0_17 = arith.constant 0 : index
    %c64_18 = arith.constant 64 : index
    %37 = vector.load %arg3[%c0_16, %c0_17, %c64_18] : memref<1x8x128xbf16, #tpu.memory_space<vmem>>, vector<1x8x64xbf16>
    %38 = vector.shape_cast %37 : vector<1x8x64xbf16> to vector<8x64xbf16>
    %c0_19 = arith.constant 0 : index
    %c0_20 = arith.constant 0 : index
    %c64_21 = arith.constant 64 : index
    %39 = vector.load %arg4[%c0_19, %c0_20, %c64_21] : memref<1x8x128xbf16, #tpu.memory_space<vmem>>, vector<1x8x64xbf16>
    %40 = vector.shape_cast %39 : vector<1x8x64xbf16> to vector<8x64xbf16>
    %cst_22 = arith.constant dense<0.000000e+00> : vector<8x8xf32>
    %41 = tpu.matmul %36, %38, %cst_22 {dimension_numbers = #tpu.dot_dimension_numbers<[1], [1], [0], [0], [0, 0, 1, 0], [], []>} : vector<8x64xbf16>, vector<8x64xbf16>, vector<8x8xf32> -> vector<8x8xf32>
    %cst_23 = arith.constant -1.000000e+30 : f32
    %42 = vector.shape_cast %2 : vector<1x8xi1> to vector<1x8xi1>
    %43 = vector.broadcast %42 : vector<1x8xi1> to vector<8x8xi1>
    %44 = vector.broadcast %cst_23 : f32 to vector<8x8xf32>
    %45 = arith.select %43, %44, %41 : vector<8x8xi1>, vector<8x8xf32>
    %cst_24 = arith.constant dense<0xFF800000> : vector<8xf32>
    %46 = vector.multi_reduction <maximumf>, %45, %cst_24 [1] : vector<8x8xf32> to vector<8xf32>
    %47 = vector.shape_cast %46 : vector<8xf32> to vector<8x1xf32>
    %48 = vector.broadcast %47 : vector<8x1xf32> to vector<8x8xf32>
    %49 = arith.subf %45, %48 : vector<8x8xf32>
    %50 = arith.truncf %49 : vector<8x8xf32> to vector<8x8xbf16>
    %51 = math.exp %50 : vector<8x8xbf16>
    %52 = arith.extf %51 : vector<8x8xbf16> to vector<8x8xf32>
    %cst_25 = arith.constant dense<0.000000e+00> : vector<8xf32>
    %53 = vector.multi_reduction <add>, %52, %cst_25 [1] : vector<8x8xf32> to vector<8xf32>
    %54 = vector.shape_cast %53 : vector<8xf32> to vector<8x1xf32>
    %cst_26 = arith.constant dense<0.000000e+00> : vector<8x64xf32>
    %55 = tpu.matmul %51, %40, %cst_26 {dimension_numbers = #tpu.dot_dimension_numbers<[1], [0], [0], [1], [0, 0, 1, 1], [], []>} : vector<8x8xbf16>, vector<8x64xbf16>, vector<8x64xf32> -> vector<8x64xf32>
    %56 = tpu.reciprocal %54 {approx = true} : vector<8x1xf32> -> vector<8x1xf32>
    %57 = vector.broadcast %56 : vector<8x1xf32> to vector<8x64xf32>
    %58 = arith.mulf %55, %57 : vector<8x64xf32>
    %59 = tpu.concatenate %30, %58 in 1 : vector<8x64xf32>, vector<8x64xf32> -> vector<8x128xf32>
    %60 = arith.truncf %59 : vector<8x128xf32> to vector<8x128xbf16>
    %c0_27 = arith.constant 0 : index
    %c0_28 = arith.constant 0 : index
    %c0_29 = arith.constant 0 : index
    %61 = vector.load %arg5[%c0_27, %c0_28, %c0_29] : memref<1x8x128xbf16, #tpu.memory_space<vmem>>, vector<1x8x128xbf16>
    %62 = vector.shape_cast %61 : vector<1x8x128xbf16> to vector<8x128xbf16>
    %63 = vector.shape_cast %60 : vector<8x128xbf16> to vector<1x8x128xbf16>
    tpu.vector_store %arg5[%c0_27, %c0_28, %c0_29], %63 {strides = array<i32>} : memref<1x8x128xbf16, #tpu.memory_space<vmem>>, vector<1x8x128xbf16>,
    return
  }
  func.func @transform_0(%arg0: i32, %arg1: i32) -> (i32, i32, i32) {
    %c0_i32 = arith.constant 0 : i32
    %c0_i32_0 = arith.constant 0 : i32
    return %arg0, %c0_i32, %arg1 : i32, i32, i32
  }
  func.func @transform_1(%arg0: i32, %arg1: i32) -> (i32, i32, i32) {
    %c1_i32 = arith.constant 1 : i32
    %0 = arith.addi %c1_i32, %arg1 : i32
    %c0_i32 = arith.constant 0 : i32
    %c0_i32_0 = arith.constant 0 : i32
    return %arg0, %c0_i32, %0 : i32, i32, i32
  }
  func.func @transform_2(%arg0: i32, %arg1: i32) -> (i32, i32, i32) {
    %c2_i32 = arith.constant 2 : i32
    %0 = arith.addi %c2_i32, %arg1 : i32
    %c0_i32 = arith.constant 0 : i32
    %c0_i32_0 = arith.constant 0 : i32
    return %arg0, %c0_i32, %0 : i32, i32, i32
  }
  func.func @transform_3(%arg0: i32, %arg1: i32) -> (i32, i32, i32) {
    %c0_i32 = arith.constant 0 : i32
    %c0_i32_0 = arith.constant 0 : i32
    return %arg0, %c0_i32, %arg1 : i32, i32, i32
  }
}

module attributes {stable_mosaic.version = 11 : i64} {
  func.func @_mm_single_kernel(%arg0: i32, %arg1: i32, %arg2: memref<16x512xbf16, #tpu.memory_space<vmem>>, %arg3: memref<512x128xbf16, #tpu.memory_space<vmem>>, %arg4: memref<1x128xf32, #tpu.memory_space<vmem>>, %arg5: memref<16x128xbf16, #tpu.memory_space<vmem>>, %arg6: memref<16x128xbf16, #tpu.memory_space<vmem>>) attributes {dimension_semantics = [#tpu.dimension_semantics<parallel>, #tpu.dimension_semantics<parallel>], iteration_bounds = array<i64: 1, 1>, scalar_prefetch = 0 : i64, scratch_operands = 0 : i64, tpu.core_type = #tpu.core_type<tc>, window_params = [{transform_indices = @transform_0, window_bounds = array<i64: 16, 512>}, {transform_indices = @transform_1, window_bounds = array<i64: 512, 128>}, {transform_indices = @transform_2, window_bounds = array<i64: 1, 128>}, {transform_indices = @transform_3, window_bounds = array<i64: 16, 128>}, {transform_indices = @transform_4, window_bounds = array<i64: 16, 128>}]} {
    %c0 = arith.constant 0 : index
    %c0_0 = arith.constant 0 : index
    %0 = vector.load %arg2[%c0, %c0_0] : memref<16x512xbf16, #tpu.memory_space<vmem>>, vector<16x512xbf16>
    %c0_1 = arith.constant 0 : index
    %c0_2 = arith.constant 0 : index
    %1 = vector.load %arg3[%c0_1, %c0_2] : memref<512x128xbf16, #tpu.memory_space<vmem>>, vector<512x128xbf16>
    %cst = arith.constant dense<0.000000e+00> : vector<16x128xf32>
    %2 = tpu.matmul %0, %1, %cst {dimension_numbers = #tpu.dot_dimension_numbers<[1], [0], [0], [1], [0, 0, 1, 1], [], []>} : vector<16x512xbf16>, vector<512x128xbf16>, vector<16x128xf32> -> vector<16x128xf32>
    %c0_3 = arith.constant 0 : index
    %c0_4 = arith.constant 0 : index
    %3 = vector.load %arg4[%c0_3, %c0_4] : memref<1x128xf32, #tpu.memory_space<vmem>>, vector<1x128xf32>
    %4 = vector.broadcast %3 : vector<1x128xf32> to vector<16x128xf32>
    %5 = arith.addf %2, %4 : vector<16x128xf32>
    %c0_5 = arith.constant 0 : index
    %c0_6 = arith.constant 0 : index
    %6 = vector.load %arg5[%c0_5, %c0_6] : memref<16x128xbf16, #tpu.memory_space<vmem>>, vector<16x128xbf16>
    %7 = arith.extf %6 : vector<16x128xbf16> to vector<16x128xf32>
    %8 = arith.addf %5, %7 : vector<16x128xf32>
    %9 = arith.truncf %8 : vector<16x128xf32> to vector<16x128xbf16>
    %c0_7 = arith.constant 0 : index
    %c0_8 = arith.constant 0 : index
    %10 = vector.load %arg6[%c0_7, %c0_8] : memref<16x128xbf16, #tpu.memory_space<vmem>>, vector<16x128xbf16>
    tpu.vector_store %arg6[%c0_7, %c0_8], %9 {strides = array<i32>} : memref<16x128xbf16, #tpu.memory_space<vmem>>, vector<16x128xbf16>,
    return
  }
  func.func @transform_0(%arg0: i32, %arg1: i32) -> (i32, i32) {
    %c0_i32 = arith.constant 0 : i32
    %c0_i32_0 = arith.constant 0 : i32
    return %arg0, %c0_i32 : i32, i32
  }
  func.func @transform_1(%arg0: i32, %arg1: i32) -> (i32, i32) {
    %c0_i32 = arith.constant 0 : i32
    %c0_i32_0 = arith.constant 0 : i32
    return %c0_i32, %arg1 : i32, i32
  }
  func.func @transform_2(%arg0: i32, %arg1: i32) -> (i32, i32) {
    %c0_i32 = arith.constant 0 : i32
    %c0_i32_0 = arith.constant 0 : i32
    return %c0_i32, %arg1 : i32, i32
  }
  func.func @transform_3(%arg0: i32, %arg1: i32) -> (i32, i32) {
    %c0_i32 = arith.constant 0 : i32
    return %arg0, %arg1 : i32, i32
  }
  func.func @transform_4(%arg0: i32, %arg1: i32) -> (i32, i32) {
    %c0_i32 = arith.constant 0 : i32
    return %arg0, %arg1 : i32, i32
  }
}

module attributes {stable_mosaic.version = 11 : i64} {
  func.func @_ln_mm_kernel(%arg0: i32, %arg1: i32, %arg2: memref<16x128xbf16, #tpu.memory_space<vmem>>, %arg3: memref<1x128xf32, #tpu.memory_space<vmem>>, %arg4: memref<1x128xf32, #tpu.memory_space<vmem>>, %arg5: memref<128x512xbf16, #tpu.memory_space<vmem>>, %arg6: memref<1x512xf32, #tpu.memory_space<vmem>>, %arg7: memref<16x512xbf16, #tpu.memory_space<vmem>>, %arg8: memref<16x128xbf16, #tpu.memory_space<vmem>>) attributes {dimension_semantics = [#tpu.dimension_semantics<parallel>, #tpu.dimension_semantics<arbitrary>], iteration_bounds = array<i64: 1, 1>, scalar_prefetch = 0 : i64, scratch_operands = 1 : i64, tpu.core_type = #tpu.core_type<tc>, window_params = [{transform_indices = @transform_0, window_bounds = array<i64: 16, 128>}, {pipeline_mode = #tpu.pipeline_mode<synchronous>, transform_indices = @transform_1, window_bounds = array<i64: 1, 128>}, {pipeline_mode = #tpu.pipeline_mode<synchronous>, transform_indices = @transform_2, window_bounds = array<i64: 1, 128>}, {transform_indices = @transform_3, window_bounds = array<i64: 128, 512>}, {transform_indices = @transform_4, window_bounds = array<i64: 1, 512>}, {transform_indices = @transform_5, window_bounds = array<i64: 16, 512>}]} {
    %c0_i32 = arith.constant 0 : i32
    %0 = arith.cmpi eq, %arg1, %c0_i32 : i32
    %1 = arith.extui %0 : i1 to i32
    %c0_i32_0 = arith.constant 0 : i32
    %2 = arith.cmpi ne, %1, %c0_i32_0 : i32
    scf.if %2 {
      %c0_11 = arith.constant 0 : index
      %c0_12 = arith.constant 0 : index
      %19 = vector.load %arg2[%c0_11, %c0_12] : memref<16x128xbf16, #tpu.memory_space<vmem>>, vector<16x128xbf16>
      %20 = arith.extf %19 : vector<16x128xbf16> to vector<16x128xf32>
      %cst_13 = arith.constant dense<0.000000e+00> : vector<16xf32>
      %21 = vector.multi_reduction <add>, %20, %cst_13 [1] : vector<16x128xf32> to vector<16xf32>
      %22 = vector.shape_cast %21 : vector<16xf32> to vector<16x1xf32>
      %cst_14 = arith.constant 1.280000e+02 : f32
      %23 = vector.broadcast %cst_14 : f32 to vector<16x1xf32>
      %24 = arith.divf %22, %23 : vector<16x1xf32>
      %25 = vector.broadcast %24 : vector<16x1xf32> to vector<16x128xf32>
      %26 = arith.subf %20, %25 : vector<16x128xf32>
      %27 = arith.mulf %26, %26 : vector<16x128xf32>
      %cst_15 = arith.constant dense<0.000000e+00> : vector<16xf32>
      %28 = vector.multi_reduction <add>, %27, %cst_15 [1] : vector<16x128xf32> to vector<16xf32>
      %29 = vector.shape_cast %28 : vector<16xf32> to vector<16x1xf32>
      %cst_16 = arith.constant 1.280000e+02 : f32
      %30 = vector.broadcast %cst_16 : f32 to vector<16x1xf32>
      %31 = arith.divf %29, %30 : vector<16x1xf32>
      %cst_17 = arith.constant 9.99999997E-7 : f32
      %32 = vector.broadcast %cst_17 : f32 to vector<16x1xf32>
      %33 = arith.addf %31, %32 : vector<16x1xf32>
      %34 = math.rsqrt %33 : vector<16x1xf32>
      %35 = vector.broadcast %34 : vector<16x1xf32> to vector<16x128xf32>
      %36 = arith.mulf %26, %35 : vector<16x128xf32>
      %c0_18 = arith.constant 0 : index
      %c0_19 = arith.constant 0 : index
      %37 = vector.load %arg3[%c0_18, %c0_19] : memref<1x128xf32, #tpu.memory_space<vmem>>, vector<1x128xf32>
      %38 = vector.broadcast %37 : vector<1x128xf32> to vector<16x128xf32>
      %39 = arith.mulf %36, %38 : vector<16x128xf32>
      %c0_20 = arith.constant 0 : index
      %c0_21 = arith.constant 0 : index
      %40 = vector.load %arg4[%c0_20, %c0_21] : memref<1x128xf32, #tpu.memory_space<vmem>>, vector<1x128xf32>
      %41 = vector.broadcast %40 : vector<1x128xf32> to vector<16x128xf32>
      %42 = arith.addf %39, %41 : vector<16x128xf32>
      %43 = arith.truncf %42 : vector<16x128xf32> to vector<16x128xbf16>
      %c0_22 = arith.constant 0 : index
      %c0_23 = arith.constant 0 : index
      %44 = vector.load %arg8[%c0_22, %c0_23] : memref<16x128xbf16, #tpu.memory_space<vmem>>, vector<16x128xbf16>
      tpu.vector_store %arg8[%c0_22, %c0_23], %43 {strides = array<i32>} : memref<16x128xbf16, #tpu.memory_space<vmem>>, vector<16x128xbf16>,
    } else {
    }
    %c0 = arith.constant 0 : index
    %c0_1 = arith.constant 0 : index
    %3 = vector.load %arg8[%c0, %c0_1] : memref<16x128xbf16, #tpu.memory_space<vmem>>, vector<16x128xbf16>
    %c0_2 = arith.constant 0 : index
    %c0_3 = arith.constant 0 : index
    %4 = vector.load %arg5[%c0_2, %c0_3] : memref<128x512xbf16, #tpu.memory_space<vmem>>, vector<128x512xbf16>
    %cst = arith.constant dense<0.000000e+00> : vector<16x512xf32>
    %5 = tpu.matmul %3, %4, %cst {dimension_numbers = #tpu.dot_dimension_numbers<[1], [0], [0], [1], [0, 0, 1, 1], [], []>} : vector<16x128xbf16>, vector<128x512xbf16>, vector<16x512xf32> -> vector<16x512xf32>
    %c0_4 = arith.constant 0 : index
    %c0_5 = arith.constant 0 : index
    %6 = vector.load %arg6[%c0_4, %c0_5] : memref<1x512xf32, #tpu.memory_space<vmem>>, vector<1x512xf32>
    %7 = vector.broadcast %6 : vector<1x512xf32> to vector<16x512xf32>
    %8 = arith.addf %5, %7 : vector<16x512xf32>
    %cst_6 = arith.constant 5.000000e-01 : f32
    %9 = vector.broadcast %cst_6 : f32 to vector<16x512xf32>
    %10 = arith.mulf %9, %8 : vector<16x512xf32>
    %cst_7 = arith.constant 0.707106769 : f32
    %11 = vector.broadcast %cst_7 : f32 to vector<16x512xf32>
    %12 = arith.mulf %8, %11 : vector<16x512xf32>
    %13 = math.erf %12 : vector<16x512xf32>
    %cst_8 = arith.constant 1.000000e+00 : f32
    %14 = vector.broadcast %cst_8 : f32 to vector<16x512xf32>
    %15 = arith.addf %14, %13 : vector<16x512xf32>
    %16 = arith.mulf %10, %15 : vector<16x512xf32>
    %17 = arith.truncf %16 : vector<16x512xf32> to vector<16x512xbf16>
    %c0_9 = arith.constant 0 : index
    %c0_10 = arith.constant 0 : index
    %18 = vector.load %arg7[%c0_9, %c0_10] : memref<16x512xbf16, #tpu.memory_space<vmem>>, vector<16x512xbf16>
    tpu.vector_store %arg7[%c0_9, %c0_10], %17 {strides = array<i32>} : memref<16x512xbf16, #tpu.memory_space<vmem>>, vector<16x512xbf16>,
    return
  }
  func.func @transform_0(%arg0: i32, %arg1: i32) -> (i32, i32) {
    %c0_i32 = arith.constant 0 : i32
    %c0_i32_0 = arith.constant 0 : i32
    return %arg0, %c0_i32 : i32, i32
  }
  func.func @transform_1(%arg0: i32, %arg1: i32) -> (i32, i32) {
    %c0_i32 = arith.constant 0 : i32
    %c0_i32_0 = arith.constant 0 : i32
    %c0_i32_1 = arith.constant 0 : i32
    return %c0_i32, %c0_i32_0 : i32, i32
  }
  func.func @transform_2(%arg0: i32, %arg1: i32) -> (i32, i32) {
    %c0_i32 = arith.constant 0 : i32
    %c0_i32_0 = arith.constant 0 : i32
    %c0_i32_1 = arith.constant 0 : i32
    return %c0_i32, %c0_i32_0 : i32, i32
  }
  func.func @transform_3(%arg0: i32, %arg1: i32) -> (i32, i32) {
    %c0_i32 = arith.constant 0 : i32
    %c0_i32_0 = arith.constant 0 : i32
    return %c0_i32, %arg1 : i32, i32
  }
  func.func @transform_4(%arg0: i32, %arg1: i32) -> (i32, i32) {
    %c0_i32 = arith.constant 0 : i32
    %c0_i32_0 = arith.constant 0 : i32
    return %c0_i32, %arg1 : i32, i32
  }
  func.func @transform_5(%arg0: i32, %arg1: i32) -> (i32, i32) {
    %c0_i32 = arith.constant 0 : i32
    return %arg0, %arg1 : i32, i32
  }
}

module attributes {stable_mosaic.version = 11 : i64} {
  func.func @_ln_mm_kernel(%arg0: i32, %arg1: i32, %arg2: memref<2x128xbf16, #tpu.memory_space<vmem>>, %arg3: memref<1x128xf32, #tpu.memory_space<vmem>>, %arg4: memref<1x128xf32, #tpu.memory_space<vmem>>, %arg5: memref<128x128xbf16, #tpu.memory_space<vmem>>, %arg6: memref<1x128xf32, #tpu.memory_space<vmem>>, %arg7: memref<2x128xf32, #tpu.memory_space<vmem>>, %arg8: memref<2x128xbf16, #tpu.memory_space<vmem>>) attributes {dimension_semantics = [#tpu.dimension_semantics<parallel>, #tpu.dimension_semantics<arbitrary>], iteration_bounds = array<i64: 1, 1>, scalar_prefetch = 0 : i64, scratch_operands = 1 : i64, tpu.core_type = #tpu.core_type<tc>, window_params = [{transform_indices = @transform_0, window_bounds = array<i64: 2, 128>}, {pipeline_mode = #tpu.pipeline_mode<synchronous>, transform_indices = @transform_1, window_bounds = array<i64: 1, 128>}, {pipeline_mode = #tpu.pipeline_mode<synchronous>, transform_indices = @transform_2, window_bounds = array<i64: 1, 128>}, {transform_indices = @transform_3, window_bounds = array<i64: 128, 128>}, {transform_indices = @transform_4, window_bounds = array<i64: 1, 128>}, {transform_indices = @transform_5, window_bounds = array<i64: 2, 128>}]} {
    %c0_i32 = arith.constant 0 : i32
    %0 = arith.cmpi eq, %arg1, %c0_i32 : i32
    %1 = arith.extui %0 : i1 to i32
    %c0_i32_0 = arith.constant 0 : i32
    %2 = arith.cmpi ne, %1, %c0_i32_0 : i32
    scf.if %2 {
      %c0_8 = arith.constant 0 : index
      %c0_9 = arith.constant 0 : index
      %11 = vector.load %arg2[%c0_8, %c0_9] : memref<2x128xbf16, #tpu.memory_space<vmem>>, vector<2x128xbf16>
      %12 = arith.extf %11 : vector<2x128xbf16> to vector<2x128xf32>
      %cst_10 = arith.constant dense<0.000000e+00> : vector<2xf32>
      %13 = vector.multi_reduction <add>, %12, %cst_10 [1] : vector<2x128xf32> to vector<2xf32>
      %14 = vector.shape_cast %13 : vector<2xf32> to vector<2x1xf32>
      %cst_11 = arith.constant 1.280000e+02 : f32
      %15 = vector.broadcast %cst_11 : f32 to vector<2x1xf32>
      %16 = arith.divf %14, %15 : vector<2x1xf32>
      %17 = vector.broadcast %16 : vector<2x1xf32> to vector<2x128xf32>
      %18 = arith.subf %12, %17 : vector<2x128xf32>
      %19 = arith.mulf %18, %18 : vector<2x128xf32>
      %cst_12 = arith.constant dense<0.000000e+00> : vector<2xf32>
      %20 = vector.multi_reduction <add>, %19, %cst_12 [1] : vector<2x128xf32> to vector<2xf32>
      %21 = vector.shape_cast %20 : vector<2xf32> to vector<2x1xf32>
      %cst_13 = arith.constant 1.280000e+02 : f32
      %22 = vector.broadcast %cst_13 : f32 to vector<2x1xf32>
      %23 = arith.divf %21, %22 : vector<2x1xf32>
      %cst_14 = arith.constant 9.99999997E-7 : f32
      %24 = vector.broadcast %cst_14 : f32 to vector<2x1xf32>
      %25 = arith.addf %23, %24 : vector<2x1xf32>
      %26 = math.rsqrt %25 : vector<2x1xf32>
      %27 = vector.broadcast %26 : vector<2x1xf32> to vector<2x128xf32>
      %28 = arith.mulf %18, %27 : vector<2x128xf32>
      %c0_15 = arith.constant 0 : index
      %c0_16 = arith.constant 0 : index
      %29 = vector.load %arg3[%c0_15, %c0_16] : memref<1x128xf32, #tpu.memory_space<vmem>>, vector<1x128xf32>
      %30 = vector.broadcast %29 : vector<1x128xf32> to vector<2x128xf32>
      %31 = arith.mulf %28, %30 : vector<2x128xf32>
      %c0_17 = arith.constant 0 : index
      %c0_18 = arith.constant 0 : index
      %32 = vector.load %arg4[%c0_17, %c0_18] : memref<1x128xf32, #tpu.memory_space<vmem>>, vector<1x128xf32>
      %33 = vector.broadcast %32 : vector<1x128xf32> to vector<2x128xf32>
      %34 = arith.addf %31, %33 : vector<2x128xf32>
      %35 = arith.truncf %34 : vector<2x128xf32> to vector<2x128xbf16>
      %c0_19 = arith.constant 0 : index
      %c0_20 = arith.constant 0 : index
      %36 = vector.load %arg8[%c0_19, %c0_20] : memref<2x128xbf16, #tpu.memory_space<vmem>>, vector<2x128xbf16>
      tpu.vector_store %arg8[%c0_19, %c0_20], %35 {strides = array<i32>} : memref<2x128xbf16, #tpu.memory_space<vmem>>, vector<2x128xbf16>,
    } else {
    }
    %c0 = arith.constant 0 : index
    %c0_1 = arith.constant 0 : index
    %3 = vector.load %arg8[%c0, %c0_1] : memref<2x128xbf16, #tpu.memory_space<vmem>>, vector<2x128xbf16>
    %c0_2 = arith.constant 0 : index
    %c0_3 = arith.constant 0 : index
    %4 = vector.load %arg5[%c0_2, %c0_3] : memref<128x128xbf16, #tpu.memory_space<vmem>>, vector<128x128xbf16>
    %cst = arith.constant dense<0.000000e+00> : vector<2x128xf32>
    %5 = tpu.matmul %3, %4, %cst {dimension_numbers = #tpu.dot_dimension_numbers<[1], [0], [0], [1], [0, 0, 1, 1], [], []>} : vector<2x128xbf16>, vector<128x128xbf16>, vector<2x128xf32> -> vector<2x128xf32>
    %c0_4 = arith.constant 0 : index
    %c0_5 = arith.constant 0 : index
    %6 = vector.load %arg6[%c0_4, %c0_5] : memref<1x128xf32, #tpu.memory_space<vmem>>, vector<1x128xf32>
    %7 = vector.broadcast %6 : vector<1x128xf32> to vector<2x128xf32>
    %8 = arith.addf %5, %7 : vector<2x128xf32>
    %9 = math.tanh %8 : vector<2x128xf32>
    %c0_6 = arith.constant 0 : index
    %c0_7 = arith.constant 0 : index
    %10 = vector.load %arg7[%c0_6, %c0_7] : memref<2x128xf32, #tpu.memory_space<vmem>>, vector<2x128xf32>
    tpu.vector_store %arg7[%c0_6, %c0_7], %9 {strides = array<i32>} : memref<2x128xf32, #tpu.memory_space<vmem>>, vector<2x128xf32>,
    return
  }
  func.func @transform_0(%arg0: i32, %arg1: i32) -> (i32, i32) {
    %c0_i32 = arith.constant 0 : i32
    %c0_i32_0 = arith.constant 0 : i32
    return %arg0, %c0_i32 : i32, i32
  }
  func.func @transform_1(%arg0: i32, %arg1: i32) -> (i32, i32) {
    %c0_i32 = arith.constant 0 : i32
    %c0_i32_0 = arith.constant 0 : i32
    %c0_i32_1 = arith.constant 0 : i32
    return %c0_i32, %c0_i32_0 : i32, i32
  }
  func.func @transform_2(%arg0: i32, %arg1: i32) -> (i32, i32) {
    %c0_i32 = arith.constant 0 : i32
    %c0_i32_0 = arith.constant 0 : i32
    %c0_i32_1 = arith.constant 0 : i32
    return %c0_i32, %c0_i32_0 : i32, i32
  }
  func.func @transform_3(%arg0: i32, %arg1: i32) -> (i32, i32) {
    %c0_i32 = arith.constant 0 : i32
    %c0_i32_0 = arith.constant 0 : i32
    return %c0_i32, %arg1 : i32, i32
  }
  func.func @transform_4(%arg0: i32, %arg1: i32) -> (i32, i32) {
    %c0_i32 = arith.constant 0 : i32
    %c0_i32_0 = arith.constant 0 : i32
    return %c0_i32, %arg1 : i32, i32
  }
  func.func @transform_5(%arg0: i32, %arg1: i32) -> (i32, i32) {
    %c0_i32 = arith.constant 0 : i32
    return %arg0, %arg1 : i32, i32
  }
}

</mosaic_0001>

<bundles_post_ra>
// kernel: vit2_forward.15
= control target key start
LH: loop header
LB: loop body
LE: loop exit
PB: predicated region body
PF: predicated region fallthrough
CT: control target
= control target key end

     0   :  { %v221_v0 = vmov 0.0   ;;  %vm222_vm0 = vmmov 0   ;;  %s284_s1 = inlined_call_operand.vmem [shape: bf16[128,128], index: 1, kind: input, shape index: {}]   ;;  %s285_s0 = inlined_call_operand.vmem [shape: bf16[16,128], index: 0, kind: input, shape index: {}]   ;;  %s286_s2 = inlined_call_operand.vmem [shape: f32[1,128], index: 2, kind: input, shape index: {}]   ;;  %s287_s3 = inlined_call_operand.vmem [shape: bf16[16,128], index: 3, kind: input, shape index: {}]   ;;  %s288_s4 = inlined_call_operand.vmem [shape: bf16[16,128], index: 4, kind: output, shape index: {}]  }
   0x1   :  { %190 = vmatprep.subr.bf16.mxu0 %v221_v0  ;;  %v212_v1 = vld [vmem:[%s284_s1] sm:$0xff]   ;;  %206 = vmatprep.mubr.msk.bf16.mxu0 %vm222_vm0, %v221_v0  ;;  %v213_v2 = vld [vmem:[%s284_s1 + $0x8] sm:$0xff]   ;;  %v214_v3 = vld [vmem:[%s284_s1 + $0x10] sm:$0xff]  }
   0x2   :  { %191 = vmatpush3.bf16.msra.mxu0 %v212_v1  ;;  %v215_v4 = vld [vmem:[%s284_s1 + $0x18] sm:$0xff]   ;;  %v216_v5 = vld [vmem:[%s284_s1 + $0x20] sm:$0xff]   ;;  %v217_v6 = vld [vmem:[%s284_s1 + $0x28] sm:$0xff]  }
   0x3   :  { %192 = vmatprep.subr.bf16.mxu0 %v221_v0  ;;  %v218_v7 = vld [vmem:[%s284_s1 + $0x30] sm:$0xff]   ;;  %v219_v8 = vld [vmem:[%s284_s1 + $0x38] sm:$0xff]   ;;  %v220_v9 = vld [vmem:[%s285_s0] sm:$0xff]  }
   0x4   :  { %v158_v10 = vld [vmem:[%s286_s2] ss:$0 sm:$0xff] }
   0x5   :  { %v173_v11 = vld [vmem:[%s287_s3] sm:$0xff]  }
   0x6   :  { %193 = vmatpush3.bf16.msra.mxu0 %v213_v2  ;;  %v174_v14 = vunpack.c.l.bf16 %v173_v11  ;;  %v175_v16 = vunpack.c.h.bf16 %v173_v11 }
   0x7   :  { %194 = vmatprep.subr.bf16.mxu0 %v221_v0 }
   0xa   :  { %195 = vmatpush3.bf16.msra.mxu0 %v214_v3 }
   0xb   :  { %196 = vmatprep.subr.bf16.mxu0 %v221_v0 }
   0xe   :  { %197 = vmatpush3.bf16.msra.mxu0 %v215_v4 }
   0xf   :  { %198 = vmatprep.subr.bf16.mxu0 %v221_v0 }
  0x12   :  { %199 = vmatpush3.bf16.msra.mxu0 %v216_v5 }
  0x13   :  { %200 = vmatprep.subr.bf16.mxu0 %v221_v0 }
  0x16   :  { %201 = vmatpush3.bf16.msra.mxu0 %v217_v6 }
  0x17   :  { %202 = vmatprep.subr.bf16.mxu0 %v221_v0 }
  0x1a   :  { %203 = vmatpush3.bf16.msra.mxu0 %v218_v7 }
  0x1b   :  { %204 = vmatprep.subr.bf16.mxu0 %v221_v0 }
  0x1e   :  { %205 = vmatpush3.bf16.msra.mxu0 %v219_v8 }
  0x21   :  { %207 = vmatmul.mubr.bf16.vlgmr.msra.gmra.mrb[0].mxu0 %v220_v9 }
  0xf4   :  { %v131_v12 = vpop.f32.mrb[0].mxu0 }
  0xf5   :  { %v132_v13 = vadd.f32 %v158_v10, %v131_v12  ;;  %v208_v15 = vpop.f32.mrb[1].mxu0 }
  0xf6   :  { %v134_v17 = vpop.f32.mrb[2].mxu0 }
  0xf7   :  { %v135_v18 = vadd.f32 %v158_v10, %v134_v17  ;;  %v209_v19 = vpop.f32.mrb[3].mxu0  ;;  %v142_v20 = vadd.f32 %v174_v14, %v132_v13 }
  0xf9   :  { %v143_v21 = vadd.f32 %v175_v16, %v135_v18 }
  0xfb   :  { %v179_v22 = vpack.c.bf16 %v143_v21, %v142_v20 }
  0xfd   :  { %180 = vst [vmem:[%s288_s4] sm:$0xff] %v179_v22  }

// kernel: vit2_forward.12
= control target key start
LH: loop header
LB: loop body
LE: loop exit
PB: predicated region body
PF: predicated region fallthrough
CT: control target
= control target key end

     0   :  { %v206_v0 = vmov 0   ;;  %vm125_vm0 = vcmask 523264   ;;  %s272_s1 = inlined_call_operand.vmem [shape: bf16[192,128], index: 1, kind: input, shape index: {}]   ;;  %s273_s0 = inlined_call_operand.vmem [shape: bf16[8,192], index: 0, kind: input, shape index: {}]   ;;  %s274_s2 = inlined_call_operand.vmem [shape: f32[1,128], index: 2, kind: input, shape index: {}]   ;;  %s275_s3 = inlined_call_operand.vmem [shape: bf16[8,128], index: 3, kind: output, shape index: {}]  }
   0x1   :  { %129 = vmatprep.subr.bf16.mxu0 %v206_v0  ;;  %v192_v1 = vld [vmem:[%s272_s1] sm:$0xff]   ;;  %v193_v2 = vld [vmem:[%s272_s1 + $0x8] sm:$0xff]   ;;  %v194_v3 = vld [vmem:[%s272_s1 + $0x10] sm:$0xff]  }
   0x2   :  { %130 = vmatpush1.bf16.msra.mxu0 %v192_v1  ;;  %v195_v4 = vld [vmem:[%s272_s1 + $0x18] sm:$0xff]   ;;  %v15_v5 = vld [vmem:[%s273_s0] sm:$0xff]  ;;  %v197_v8 = vld [vmem:[%s272_s1 + $0x28] sm:$0xff]  }
   0x3   :  { %131 = vmatprep.subr.bf16.mxu0 %v206_v0  ;;  %v177_v6 = vcombine.high %v15_v5, %v15_v5  ;;  %v196_v7 = vld [vmem:[%s272_s1 + $0x20] sm:$0xff]   ;;  %v198_v9 = vld [vmem:[%s272_s1 + $0x30] sm:$0xff]   ;;  %v199_v10 = vld [vmem:[%s272_s1 + $0x38] sm:$0xff]   ;;  %v176_v15 = vcombine.low %v15_v5, %v15_v5 }
   0x4   :  { %v200_v11 = vld [vmem:[%s272_s1 + $0x40] sm:$0xff]   ;;  %v201_v12 = vld [vmem:[%s272_s1 + $0x48] sm:$0xff]   ;;  %v202_v13 = vld [vmem:[%s272_s1 + $0x50] sm:$0xff]  }
   0x5   :  { %190 = vmatprep.mubr.msk.bf16.mxu0 %vm125_vm0, %v177_v6  ;;  %v203_v14 = vld [vmem:[%s272_s1 + $0x58] sm:$0xff]   ;;  %v175_v16 = vld [vmem:[%s274_s2] ss:$0 sm:$0xff] }
   0x6   :  { %132 = vmatpush1.bf16.msra.mxu0 %v193_v2 }
   0x7   :  { %133 = vmatprep.subr.bf16.mxu0 %v206_v0 }
   0xa   :  { %134 = vmatpush1.bf16.msra.mxu0 %v194_v3 }
   0xb   :  { %135 = vmatprep.subr.bf16.mxu0 %v206_v0 }
   0xe   :  { %136 = vmatpush1.bf16.msra.mxu0 %v195_v4 }
   0xf   :  { %137 = vmatprep.subr.bf16.mxu0 %v206_v0 }
  0x12   :  { %138 = vmatpush1.bf16.msra.mxu0 %v196_v7 }
  0x13   :  { %139 = vmatprep.subr.bf16.mxu0 %v206_v0 }
  0x16   :  { %140 = vmatpush1.bf16.msra.mxu0 %v197_v8 }
  0x17   :  { %141 = vmatprep.subr.bf16.mxu0 %v206_v0 }
  0x1a   :  { %142 = vmatpush1.bf16.msra.mxu0 %v198_v9 }
  0x1b   :  { %143 = vmatprep.subr.bf16.mxu0 %v206_v0 }
  0x1e   :  { %144 = vmatpush1.bf16.msra.mxu0 %v199_v10 }
  0x1f   :  { %145 = vmatprep.subr.bf16.mxu0 %v206_v0 }
  0x22   :  { %146 = vmatpush1.bf16.msra.mxu0 %v200_v11 }
  0x23   :  { %147 = vmatprep.subr.bf16.mxu0 %v206_v0 }
  0x26   :  { %148 = vmatpush1.bf16.msra.mxu0 %v201_v12 }
  0x27   :  { %149 = vmatprep.subr.bf16.mxu0 %v206_v0 }
  0x2a   :  { %150 = vmatpush1.bf16.msra.mxu0 %v202_v13 }
  0x2b   :  { %151 = vmatprep.subr.bf16.mxu0 %v206_v0 }
  0x2e   :  { %152 = vmatpush1.bf16.msra.mxu0 %v203_v14 }
  0x31   :  { %162 = vmatmul.mubr.bf16.vlgmr.msra.gmra.mrb[0].mxu0 %v176_v15 }
 0x104   :  { %v163_v17 = vpop.f32.mrb[0].mxu0 }
 0x105   :  { %v164_v18 = vadd.f32 %v175_v16, %v163_v17  ;;  %v165_v19 = vpop.f32.mrb[1].mxu0 }
 0x106   :  { %v166_v20 = vpop.f32.mrb[2].mxu0 }
 0x107   :  { %v169_v21 = vpack.c.bf16 %v164_v18, %v164_v18  ;;  %v167_v22 = vpop.f32.mrb[3].mxu0 }
 0x109   :  { %170 = vst [vmem:[%s275_s3] sm:$0xf] %v169_v21 }

// kernel: vit2_forward.13
= control target key start
LH: loop header
LB: loop body
LE: loop exit
PB: predicated region body
PF: predicated region fallthrough
CT: control target
= control target key end

     0   :  { %v468_v4 = vmov 0.0   ;;  %v469_v31 = vmov 0   ;;  %vm470_vm0 = vmmov 0   ;;  %v107_v54 = vlaneseq  ;;  %s616_s0 = inlined_call_operand.vmem [shape: bf16[16,128], index: 0, kind: input, shape index: {}]   ;;  %s617_s3 = inlined_call_operand.vmem [shape: bf16[128,384], index: 3, kind: input, shape index: {}]   ;;  %s618_s1 = inlined_call_operand.vmem [shape: f32[1,128], index: 1, kind: input, shape index: {}]   ;;  %s619_s2 = inlined_call_operand.vmem [shape: f32[1,128], index: 2, kind: input, shape index: {}]   ;;  %s620_s4 = inlined_call_operand.vmem [shape: f32[1,384], index: 4, kind: input, shape index: {}]   ;;  %s621_s5 = inlined_call_operand.vmem [shape: bf16[16,384], index: 5, kind: output, shape index: {}]  }
   0x1   :  { %v397_v0 = vld [vmem:[%s616_s0] sm:$0xff]   ;;  %409 = vmatprep.subr.bf16.mxu1 %v468_v4  ;;  %v435_v6 = vld [vmem:[%s617_s3 + $0x8] ss:$12 sps:$4 sm:$0xff]   ;;  %v442_v19 = vld [vmem:[%s617_s3 + $0x30] ss:$12 sps:$4 sm:$0xff]   ;;  %282 = vmatprep.mubr.bf16.mxu0 %v469_v31 }
   0x2   :  { %v398_v1 = vunpack.c.l.bf16 %v397_v0  ;;  %v399_v2 = vunpack.c.h.bf16 %v397_v0  ;;  %v432_v3 = vld [vmem:[%s617_s3 + $0x4] ss:$12 sps:$4 sm:$0xff]   ;;  %v434_v5 = vld [vmem:[%s617_s3] ss:$12 sps:$4 sm:$0xff]   ;;  %v436_v7 = vld [vmem:[%s617_s3 + $0x1c] ss:$12 sps:$4 sm:$0xff]   ;;  %410 = vmatpush3.bf16.msra.mxu1 %v435_v6  ;;  %425 = vmatprep.mubr.msk.bf16.mxu1 %vm470_vm0, %v468_v4 }
   0x3   :  { %250 = vmatprep.subr.bf16.mxu0 %v432_v3  ;;  %411 = vmatprep.subr.bf16.mxu1 %v468_v4  ;;  %v438_v16 = vld [vmem:[%s617_s3 + $0x18] ss:$12 sps:$4 sm:$0xff]   ;;  %v439_v17 = vld [vmem:[%s617_s3 + $0x20] ss:$12 sps:$4 sm:$0xff]   ;;  %v446_v22 = vld [vmem:[%s617_s3 + $0x48] ss:$12 sps:$4 sm:$0xff]  }
   0x4   :  { %29 = vadd.xlane.f32.xlu0 %v398_v1  ;;  %251 = vmatpush1.bf16.msra.mxu0 %v434_v5  ;;  %v440_v18 = vld [vmem:[%s617_s3 + $0x34] ss:$12 sps:$4 sm:$0xff]   ;;  %v443_v20 = vld [vmem:[%s617_s3 + $0x38] ss:$12 sps:$4 sm:$0xff]   ;;  %v447_v23 = vld [vmem:[%s617_s3 + $0x50] ss:$12 sps:$4 sm:$0xff]  }
   0x5   :  { %252 = vmatprep.subr.bf16.mxu0 %v436_v7  ;;  %v444_v21 = vld [vmem:[%s617_s3 + $0x4c] ss:$12 sps:$4 sm:$0xff]   ;;  %v448_v24 = vld [vmem:[%s617_s3 + $0x64] ss:$12 sps:$4 sm:$0xff]   ;;  %v451_v26 = vld [vmem:[%s617_s3 + $0x68] ss:$12 sps:$4 sm:$0xff]  }
   0x6   :  { %412 = vmatpush3.bf16.msra.mxu1 %v439_v17  ;;  %v450_v25 = vld [vmem:[%s617_s3 + $0x60] ss:$12 sps:$4 sm:$0xff]   ;;  %v452_v27 = vld [vmem:[%s617_s3 + $0x7c] ss:$12 sps:$4 sm:$0xff]   ;;  %v454_v28 = vld [vmem:[%s617_s3 + $0x78] ss:$12 sps:$4 sm:$0xff]  }
   0x7   :  { %413 = vmatprep.subr.bf16.mxu1 %v468_v4  ;;  %v455_v29 = vld [vmem:[%s617_s3 + $0x80] ss:$12 sps:$4 sm:$0xff]   ;;  %v458_v32 = vld [vmem:[%s617_s3 + $0x90] ss:$12 sps:$4 sm:$0xff]   ;;  %v459_v33 = vld [vmem:[%s617_s3 + $0x98] ss:$12 sps:$4 sm:$0xff]  }
   0x8   :  { %31 = vadd.xlane.f32.xlu0 %v399_v2  ;;  %253 = vmatpush1.bf16.msra.mxu0 %v438_v16  ;;  %v456_v30 = vld [vmem:[%s617_s3 + $0x94] ss:$12 sps:$4 sm:$0xff]   ;;  %v460_v34 = vld [vmem:[%s617_s3 + $0xac] ss:$12 sps:$4 sm:$0xff]   ;;  %v463_v36 = vld [vmem:[%s617_s3 + $0xb0] ss:$12 sps:$4 sm:$0xff]  }
   0x9   :  { %254 = vmatprep.subr.bf16.mxu0 %v440_v18  ;;  %v462_v35 = vld [vmem:[%s617_s3 + $0xa8] ss:$12 sps:$4 sm:$0xff]   ;;  %v362_v45 = vld [vmem:[%s618_s1] ss:$0 sm:$0xff]  ;;  %v108_v55 = vshrl.u32 %v107_v54, 7 }
   0xa   :  { %414 = vmatpush3.bf16.msra.mxu1 %v443_v20  ;;  %v363_v49 = vld [vmem:[%s619_s2] ss:$0 sm:$0xff] }
   0xb   :  { %415 = vmatprep.subr.bf16.mxu1 %v468_v4  ;;  %v109_v56 = vsub.s32 0, %v108_v55  ;;  %v117_v57 = vsub.s32 2, %v108_v55  ;;  %v105_v58 = vld [vmem:[%s620_s4] sm:$0x7]  ;;  %v113_v59 = vsub.s32 1, %v108_v55 }
   0xc   :  { %255 = vmatpush1.bf16.msra.mxu0 %v442_v19 }
   0xd   :  { %256 = vmatprep.subr.bf16.mxu0 %v444_v21  ;;  %v110_v60 = vrot.slane %v105_v58, %v109_v56  ;;  %v118_v61 = vrot.slane %v105_v58, %v117_v57  ;;  %v114_v62 = vrot.slane %v105_v58, %v113_v59 }
   0xe   :  { %416 = vmatpush3.bf16.msra.mxu1 %v447_v23 }
   0xf   :  { %417 = vmatprep.subr.bf16.mxu1 %v468_v4 }
  0x10   :  { %257 = vmatpush1.bf16.msra.mxu0 %v446_v22 }
  0x11   :  { %258 = vmatprep.subr.bf16.mxu0 %v448_v24 }
  0x12   :  { %418 = vmatpush3.bf16.msra.mxu1 %v451_v26 }
  0x13   :  { %419 = vmatprep.subr.bf16.mxu1 %v468_v4 }
  0x14   :  { %259 = vmatpush1.bf16.msra.mxu0 %v450_v25 }
  0x15   :  { %260 = vmatprep.subr.bf16.mxu0 %v452_v27 }
  0x16   :  { %420 = vmatpush3.bf16.msra.mxu1 %v455_v29 }
  0x17   :  { %421 = vmatprep.subr.bf16.mxu1 %v468_v4 }
  0x18   :  { %261 = vmatpush1.bf16.msra.mxu0 %v454_v28 }
  0x19   :  { %262 = vmatprep.subr.bf16.mxu0 %v456_v30 }
  0x1a   :  { %422 = vmatpush3.bf16.msra.mxu1 %v459_v33 }
  0x1b   :  { %423 = vmatprep.subr.bf16.mxu1 %v468_v4 }
  0x1c   :  { %263 = vmatpush1.bf16.msra.mxu0 %v458_v32 }
  0x1d   :  { %264 = vmatprep.subr.bf16.mxu0 %v460_v34 }
  0x1e   :  { %424 = vmatpush3.bf16.msra.mxu1 %v463_v36 }
  0x20   :  { %265 = vmatpush1.bf16.msra.mxu0 %v462_v35 }
  0x91   :  { %v30_v8 = vpop.xlane.xlu0 %29 }
  0x92   :  { %v34_v9 = vmul.f32 0.0078125, %v30_v8 }
  0x94   :  { %v518_v10 = vsub.f32 %v398_v1, %v34_v9 }
  0x95   :  { %v32_v11 = vpop.xlane.xlu0 %31 }
  0x96   :  { %v35_v12 = vmul.f32 0.0078125, %v32_v11  ;;  %v38_v13 = vmul.f32 %v518_v10, %v518_v10 }
  0x98   :  { %v522_v14 = vsub.f32 %v399_v2, %v35_v12  ;;  %40 = vadd.xlane.f32.xlu1 %v38_v13 }
  0x9a   :  { %v39_v15 = vmul.f32 %v522_v14, %v522_v14 }
  0x9c   :  { %42 = vadd.xlane.f32.xlu1 %v39_v15 }
 0x125   :  { %v41_v37 = vpop.xlane.xlu1 %40 }
 0x126   :  { %v44_v38 = vmul.f32 0.0078125, %v41_v37 }
 0x128   :  { %v46_v39 = vadd.f32 1e-06, %v44_v38 }
 0x129   :  { %v43_v40 = vpop.xlane.xlu1 %42 }
 0x12a   :  { %464 = vrsqrt.f32 %v46_v39  ;;  %v45_v41 = vmul.f32 0.0078125, %v43_v40 }
 0x12c   :  { %v47_v42 = vadd.f32 1e-06, %v45_v41 }
 0x12e   :  { %466 = vrsqrt.f32 %v47_v42 }
 0x134   :  { %v465_v43 = vpop.eup %464 }
 0x135   :  { %v50_v44 = vmul.f32 %v465_v43, %v518_v10 }
 0x137   :  { %v59_v48 = vmul.f32 %v362_v45, %v50_v44 }
 0x138   :  { %v467_v46 = vpop.eup %466 }
 0x139   :  { %v51_v47 = vmul.f32 %v467_v46, %v522_v14  ;;  %v68_v51 = vadd.f32 %v363_v49, %v59_v48 }
 0x13b   :  { %v60_v50 = vmul.f32 %v362_v45, %v51_v47 }
 0x13d   :  { %v69_v52 = vadd.f32 %v363_v49, %v60_v50 }
 0x13f   :  { %v70_v53 = vpack.c.bf16 %v69_v52, %v68_v51 }
 0x141   :  { %283 = vmatmul.mubr.bf16.vlgmr.msra.gmra.mrb[0].mxu0 %v70_v53  ;;  %426 = vmatmul.mubr.bf16.vlgmr.msra.gmra.mrb[0].mxu1 %v70_v53 }
 0x214   :  { %v284_v63 = vpop.f32.mrb[0].mxu0  ;;  %v327_v0 = vpop.f32.mrb[0].mxu1 }
 0x215   :  { %v285_v1 = vadd.f32 %v284_v63, %v110_v60  ;;  %v328_v2 = vadd.f32 %v327_v0, %v118_v61  ;;  %v286_v3 = vpop.f32.mrb[1].mxu0  ;;  %v427_v4 = vpop.f32.mrb[1].mxu1 }
 0x216   :  { %v287_v5 = vadd.f32 %v286_v3, %v114_v62  ;;  %v288_v6 = vpop.f32.mrb[2].mxu0  ;;  %v330_v7 = vpop.f32.mrb[2].mxu1 }
 0x217   :  { %v393_v8 = vpack.c.bf16 %v328_v2, %v328_v2  ;;  %v289_v9 = vadd.f32 %v288_v6, %v110_v60  ;;  %v331_v10 = vadd.f32 %v330_v7, %v118_v61  ;;  %v290_v11 = vpop.f32.mrb[3].mxu0  ;;  %v428_v12 = vpop.f32.mrb[3].mxu1 }
 0x218   :  { %v392_v13 = vpack.c.bf16 %v287_v5, %v285_v1  ;;  %v291_v14 = vadd.f32 %v290_v11, %v114_v62 }
 0x219   :  { %355 = vst [vmem:[%s621_s5 + $0x8] sm:$0xf] %v393_v8  ;;  %v395_v15 = vpack.c.bf16 %v331_v10, %v331_v10 }
 0x21a   :  { %354 = vst [vmem:[%s621_s5] sm:$0xff] %v392_v13  ;;  %v394_v16 = vpack.c.bf16 %v291_v14, %v289_v9 }
 0x21b   :  { %357 = vst [vmem:[%s621_s5 + $0x14] sm:$0xf] %v395_v15 }
 0x21c   :  { %356 = vst [vmem:[%s621_s5 + $0xc] sm:$0xff] %v394_v16 }

// kernel: vit2_forward.14
= control target key start
LH: loop header
LB: loop body
LE: loop exit
PB: predicated region body
PF: predicated region fallthrough
CT: control target
= control target key end

     0   :  { %s778_s12 = smov 0   ;;  %s780_s13 = smov 0   ;;  %s849_s0 = inlined_call_operand.vmem [shape: bf16[2,8,384], index: 0, kind: input, shape index: {}, may-alias: {0,1,2}]   ;;  %s850_s1 = inlined_call_operand.vmem [shape: bf16[2,8,384], index: 1, kind: input, shape index: {}, may-alias: {0,1,2}]   ;;  %s851_s2 = inlined_call_operand.vmem [shape: bf16[2,8,384], index: 2, kind: input, shape index: {}, may-alias: {0,1,2}]   ;;  %s852_s3 = inlined_call_operand.vmem [shape: bf16[2,8,128], index: 3, kind: output, shape index: {}]  }
   0x1   :  { %s782_s14 = smov 0  }
   0x2 LB: > { %s25_s15 = sadd.s32 1, %s749_s13  ;;  %p642_p0 = scmp.ge.s32.totalorder %s753_s14, 1  ;;  %s753_s14 = sphi %s782_s14, %s13_s14   ;;  %s749_s13 = sphi %s780_s13, %s854_s13   ;;  %s745_s12 = sphi %s778_s12, %s853_s12  }
   0x3   : > { %p27_p1 = scmp.ge.s32.totalorder %s25_s15, 2  ;;  %p194_p2 = scmp.lt.s32.totalorder %s753_s14, 3 }
   0x5   : > { %s856_s15 = smov (%p27_p1, %s25_s15), 0  ;;  %p195_p3 = pnand %p642_p0, %p194_p2 }
   0x6   : > { %p241_p4 = scmp.lt.s32.totalorder (!%p195_p3), %s745_s12, 1  ;;  %v755_v0 = vmov (!%p195_p3), 0.0   ;;  %vm756_vm0 = vmmov (!%p195_p3), 0   ;;  %vm286_vm1 = vcmask (!%p195_p3), 523264   ;;  %s757_s24 = smov (!%p195_p3), 64   ;;  %v277_v7 = vlaneseq (!%p195_p3) }
   0x7   : > { %198 = sbr.rel (%p195_p3) target bundleno = 1117 (0x45d), region = 32  ;;  %667 = vmatprep.subr.bf16.mxu0 (!%p195_p3), %v755_v0  ;;  %669 = vmatprep.mubr.msk.bf16.mxu0 (!%p195_p3), %vm756_vm0, %v755_v0  ;;  %vm336_vm3 = vcmask (!%p195_p3), 64512   ;;  %vm352_vm4 = vcmask (!%p195_p3), 1043456  }
   0x8   : > { %673 = vmatprep.subr.bf16.mxu1 (!%p195_p3), %v755_v0  ;;  %675 = vmatprep.mubr.msk.bf16.mxu1 (!%p195_p3), %vm756_vm0, %v755_v0  ;;  %v278_v8 = vand.u32 (!%p195_p3), 127, %v277_v7 }
   0xa   : > { %vm279_vm2 = vcmp.ge.s32.totalorder (!%p195_p3), %v278_v8, 5 }
   0xe   : > { %s858_s12 = smov (!%p241_p4, %s745_s12), 1 }
   0xf   : > { %s801_s16 = smul.u32 12, %s858_s12  ;;  %s646_s29 = sshll.u32 %s858_s12, 2 }
  0x10   : > { %s275_s5 = scalar_lea.vmem %s852_s3, %s646_s29 }
  0x11   : > { %s656_s17 = sadd.s32 4, %s801_s16  ;;  %s248_s20 = scalar_lea.vmem %s849_s0, %s801_s16 }
  0x12   : > { %s257_s23 = scalar_lea.vmem %s850_s1, %s656_s17  ;;  %v280_v1 = vld [vmem:[%s248_s20] sm:$0xf]  ;;  %s658_s25 = sadd.s32 8, %s801_s16 }
  0x13   : > { %v284_v2 = vld [vmem:[%s257_s23] sm:$0xf]  ;;  %v281_v3 = vunpack.c.l.bf16 %v280_v1  ;;  %s267_s28 = scalar_lea.vmem %s851_s2, %s658_s25 }
  0x14   : > { %v291_v4 = vsel %vm286_vm1, %v284_v2, 0  ;;  %v649_v15 = vcombine.low %v284_v2, %v284_v2  ;;  %v285_v16 = vld [vmem:[%s267_s28] sm:$0xf] }
  0x15   : > { %668 = vmatpush3.bf16.xpose.msra.mxu0 %v291_v4  ;;  %v282_v5 = vmul.f32 0.125, %v281_v3  ;;  %v354_v17 = vsel %vm352_vm4, %v285_v16, 0  ;;  %v651_v18 = vcombine.low %v285_v16, %v285_v16 }
  0x16   : > { %685 = vmatprep.subr.bf16.mxu0 %v755_v0  ;;  %674 = vmatpush3.bf16.msra.mxu1 %v354_v17 }
  0x17   : > { %v283_v6 = vpack.c.bf16 %v282_v5, %v282_v5  ;;  %679 = vmatprep.subr.bf16.mxu1 %v755_v0 }
  0x19   : > { %399 = vrot.lane.b32.xlu1 %v283_v6, %s757_s24 }
  0x1c   : > { %670 = vmatmul.mubr.msk.bf16.vlgmr.msra.gmra.mrb[0].mxu0 %vm286_vm1, %v283_v6 }
  0x1d   : > { %687 = vmatprep.mubr.msk.bf16.mxu0 %vm756_vm0, %v755_v0 }
  0x8b   : > { %v400_v26 = vpop.permute.xlu1 %399 }
  0xef   : > { %v327_v9 = vpop.f32.mrb[0].mxu0 }
  0xf0   : > { %v335_v10 = vsel %vm279_vm2, -1e+30, %v327_v9  ;;  %v671_v11 = vpop.f32.mrb[1].mxu0 }
  0xf1   : > { %v330_v12 = vpop.f32.mrb[2].mxu0  ;;  %v337_v13 = vsel %vm336_vm3, %v335_v10, -inf }
  0xf2   : > { %338 = vmax.xlane.f32.xlu0 %v337_v13  ;;  %v672_v14 = vpop.f32.mrb[3].mxu0 }
 0x108   : > { %404 = vrot.lane.b32.xlu0 %v649_v15, %s757_s24 }
 0x10c   : > { %468 = vrot.lane.b32.xlu0 %v651_v18, %s757_s24 }
 0x17f   : > { %v339_v19 = vpop.xlane.xlu0 %338 }
 0x180   : > { %v340_v20 = vsub.f32 %v335_v10, %v339_v19 }
 0x182   : > { %v341_v21 = vpack.c.bf16 %v340_v20, %v340_v20 }
 0x183   : > { %v405_v23 = vpop.permute.xlu0 %404 }
 0x184   : > { %v343_v22 = vmul.bf16 1069105081, %v341_v21  ;;  %v410_v24 = vsel %vm286_vm1, %v405_v23, 0 }
 0x186   : > { %723 = vpow.bf16 %v343_v22 }
 0x187   : > { %v469_v39 = vpop.permute.xlu0 %468 }
 0x188   : > { %v474_v40 = vsel %vm352_vm4, %v469_v39, 0 }
 0x189   : > { %686 = vmatpush3.bf16.msra.mxu0 %v474_v40 }
 0x191   : > { %v724_v25 = vpop.eup %723 }
 0x192   : > { %676 = vmatmul.mubr.msk.bf16.vlgmr.msra.gmra.mrb[0].mxu1 %vm336_vm3, %v724_v25  ;;  %v345_v36 = vunpack.c.l.bf16 %v724_v25 }
 0x193   : > { %680 = vmatpush3.bf16.xpose.msra.mxu1 %v410_v24  ;;  %681 = vmatprep.mubr.msk.bf16.mxu1 %vm756_vm0, %v755_v0 }
 0x194   : > { %v346_v38 = vsel %vm336_vm3, %v345_v36, 0.0 }
 0x19a   : > { %682 = vmatmul.mubr.msk.bf16.vlgmr.msra.gmra.mrb[4].mxu1 %vm286_vm1, %v400_v26 }
 0x265   : > { %v390_v27 = vpop.f32.mrb[0].mxu1 }
 0x266   : > { %v677_v28 = vpop.f32.mrb[1].mxu1 }
 0x267   : > { %v393_v29 = vpop.f32.mrb[2].mxu1 }
 0x268   : > { %v678_v30 = vpop.f32.mrb[3].mxu1 }
 0x26d   : > { %v446_v31 = vpop.f32.mrb[4].mxu1 }
 0x26e   : > { %v452_v32 = vsel %vm279_vm2, -1e+30, %v446_v31  ;;  %v683_v33 = vpop.f32.mrb[5].mxu1 }
 0x26f   : > { %v449_v34 = vpop.f32.mrb[6].mxu1  ;;  %v453_v35 = vsel %vm336_vm3, %v452_v32, -inf }
 0x270   : > { %454 = vmax.xlane.f32.xlu1 %v453_v35  ;;  %v684_v37 = vpop.f32.mrb[7].mxu1 }
 0x274   : > { %347 = vadd.xlane.f32.xlu1 %v346_v38 }
 0x2fd   : > { %v455_v41 = vpop.xlane.xlu1 %454 }
 0x2fe   : > { %v456_v42 = vsub.f32 %v452_v32, %v455_v41 }
 0x300   : > { %v457_v43 = vpack.c.bf16 %v456_v42, %v456_v42 }
 0x301   : > { %v348_v55 = vpop.xlane.xlu1 %347 }
 0x302   : > { %v459_v44 = vmul.bf16 1069105081, %v457_v43 }
 0x304   : > { %725 = vpow.bf16 %v459_v44 }
 0x30f   : > { %v726_v45 = vpop.eup %725 }
 0x310   : > { %688 = vmatmul.mubr.msk.bf16.vlgmr.msra.gmra.mrb[4].mxu0 %vm336_vm3, %v726_v45  ;;  %v461_v46 = vunpack.c.l.bf16 %v726_v45 }
 0x312   : > { %v462_v47 = vsel %vm336_vm3, %v461_v46, 0.0 }
 0x313   : > { %463 = vadd.xlane.f32.xlu0 %v462_v47 }
 0x3a0   : > { %v464_v48 = vpop.xlane.xlu0 %463 }
 0x3a1   : > { %727 = vrcp.f32 %v464_v48 }
 0x3a2   : > { %729 = vrcp.f32 %v348_v55 }
 0x3ab   : > { %v728_v49 = vpop.eup %727 }
 0x3ac   : > { %v730_v56 = vpop.eup %729 }
 0x3ad   : > { %v397_v57 = vmul.f32 %v730_v56, %v390_v27 }
 0x3e3   : > { %v510_v50 = vpop.f32.mrb[4].mxu0 }
 0x3e4   : > { %v517_v51 = vmul.f32 %v728_v49, %v510_v50  ;;  %v689_v52 = vpop.f32.mrb[5].mxu0 }
 0x3e5   : > { %v513_v53 = vpop.f32.mrb[6].mxu0 }
 0x3e6   : > { %519 = vrot.lane.b32.xlu1 %v517_v51, %s757_s24  ;;  %v690_v54 = vpop.f32.mrb[7].mxu0 }
 0x458   : > { %v520_v58 = vpop.permute.xlu1 %519 }
 0x459   : > { %v522_v59 = vsel %vm286_vm1, %v397_v57, %v520_v58 }
 0x45a   : > { %v523_v60 = vpack.c.bf16 %v522_v59, %v522_v59 }
 0x45c   : > { %524 = vst [vmem:[%s275_s5] sm:$0xf] %v523_v60 }
 0x45d PF: > { %s13_s14 = sadd.s32 1, %s753_s14   ;;  %s853_s12 = smov %s749_s13 }
 0x45e   : > { %p10_p5 = scmp.ge.s32.totalorder %s13_s14, 4   ;;  %s854_s13 = smov %s856_s15 }
 0x460   :  { %12 = sbr.rel (!%p10_p5) target bundleno = 2 (0x2), region = 68 }

// kernel: vit2_forward.17
= control target key start
LH: loop header
LB: loop body
LE: loop exit
PB: predicated region body
PF: predicated region fallthrough
CT: control target
= control target key end

     0   :  { %s681_s1 = inlined_call_operand.vmem [shape: bf16[512,128], index: 1, kind: input, shape index: {}]   ;;  %s682_s0 = inlined_call_operand.vmem [shape: bf16[16,512], index: 0, kind: input, shape index: {}]   ;;  %s683_s2 = inlined_call_operand.vmem [shape: f32[1,128], index: 2, kind: input, shape index: {}]   ;;  %s684_s3 = inlined_call_operand.vmem [shape: bf16[16,128], index: 3, kind: input, shape index: {}]   ;;  %s685_s4 = inlined_call_operand.vmem [shape: bf16[16,128], index: 4, kind: output, shape index: {}]  }
   0x1   :  { %v501_v0 = vld [vmem:[%s681_s1 + $0x40] sm:$0xff]   ;;  %v505_v4 = vld [vmem:[%s681_s1 + $0x48] sm:$0xff]   ;;  %v509_v8 = vld [vmem:[%s681_s1 + $0x50] sm:$0xff]  }
   0x2   :  { %v502_v1 = vld [vmem:[%s681_s1 + $0xc0] sm:$0xff]   ;;  %457 = vmatprep.subr.bf16.mxu0 %v501_v0  ;;  %v506_v5 = vld [vmem:[%s681_s1 + $0xc8] sm:$0xff]   ;;  %v510_v9 = vld [vmem:[%s681_s1 + $0xd0] sm:$0xff]  }
   0x3   :  { %v503_v2 = vld [vmem:[%s681_s1] sm:$0xff]   ;;  %479 = vmatprep.subr.bf16.mxu1 %v502_v1  ;;  %v507_v6 = vld [vmem:[%s681_s1 + $0x8] sm:$0xff]   ;;  %v511_v10 = vld [vmem:[%s681_s1 + $0x10] sm:$0xff]  }
   0x4   :  { %v504_v3 = vld [vmem:[%s681_s1 + $0x80] sm:$0xff]   ;;  %458 = vmatpush3.bf16.msra.mxu0 %v503_v2  ;;  %v508_v7 = vld [vmem:[%s681_s1 + $0x88] sm:$0xff]   ;;  %v512_v11 = vld [vmem:[%s681_s1 + $0x90] sm:$0xff]  }
   0x5   :  { %480 = vmatpush3.bf16.msra.mxu1 %v504_v3  ;;  %459 = vmatprep.subr.bf16.mxu0 %v505_v4  ;;  %v513_v12 = vld [vmem:[%s681_s1 + $0x58] sm:$0xff]   ;;  %v517_v16 = vld [vmem:[%s681_s1 + $0x60] sm:$0xff]   ;;  %v521_v20 = vld [vmem:[%s681_s1 + $0x68] sm:$0xff]  }
   0x6   :  { %481 = vmatprep.subr.bf16.mxu1 %v506_v5  ;;  %v514_v13 = vld [vmem:[%s681_s1 + $0xd8] sm:$0xff]   ;;  %v518_v17 = vld [vmem:[%s681_s1 + $0xe0] sm:$0xff]   ;;  %v522_v21 = vld [vmem:[%s681_s1 + $0xe8] sm:$0xff]  }
   0x7   :  { %v515_v14 = vld [vmem:[%s681_s1 + $0x18] sm:$0xff]   ;;  %v519_v18 = vld [vmem:[%s681_s1 + $0x20] sm:$0xff]   ;;  %v523_v22 = vld [vmem:[%s681_s1 + $0x28] sm:$0xff]  }
   0x8   :  { %460 = vmatpush3.bf16.msra.mxu0 %v507_v6  ;;  %v516_v15 = vld [vmem:[%s681_s1 + $0x98] sm:$0xff]   ;;  %v520_v19 = vld [vmem:[%s681_s1 + $0xa0] sm:$0xff]   ;;  %v524_v23 = vld [vmem:[%s681_s1 + $0xa8] sm:$0xff]  }
   0x9   :  { %482 = vmatpush3.bf16.msra.mxu1 %v508_v7  ;;  %461 = vmatprep.subr.bf16.mxu0 %v509_v8  ;;  %v525_v24 = vld [vmem:[%s681_s1 + $0x70] sm:$0xff]   ;;  %v529_v28 = vld [vmem:[%s681_s1 + $0x78] sm:$0xff]   ;;  %v407_v38 = vld [vmem:[%s683_s2] ss:$0 sm:$0xff] }
   0xa   :  { %483 = vmatprep.subr.bf16.mxu1 %v510_v9  ;;  %v526_v25 = vld [vmem:[%s681_s1 + $0xf0] sm:$0xff]   ;;  %v530_v29 = vld [vmem:[%s681_s1 + $0xf8] sm:$0xff]   ;;  %v449_v44 = vld [vmem:[%s684_s3] sm:$0xff]  }
   0xb   :  { %v527_v26 = vld [vmem:[%s681_s1 + $0x30] sm:$0xff]   ;;  %v531_v30 = vld [vmem:[%s681_s1 + $0x38] sm:$0xff]   ;;  %v450_v52 = vunpack.c.l.bf16 %v449_v44  ;;  %v451_v54 = vunpack.c.h.bf16 %v449_v44 }
   0xc   :  { %462 = vmatpush3.bf16.msra.mxu0 %v511_v10  ;;  %v528_v27 = vld [vmem:[%s681_s1 + $0xb0] sm:$0xff]   ;;  %v532_v31 = vld [vmem:[%s681_s1 + $0xb8] sm:$0xff]  }
   0xd   :  { %484 = vmatpush3.bf16.msra.mxu1 %v512_v11  ;;  %463 = vmatprep.subr.bf16.mxu0 %v513_v12  ;;  %v533_v32 = vld [vmem:[%s682_s0] ss:$16 sps:$4 sm:$0xff]   ;;  %v535_v33 = vld [vmem:[%s682_s0 + $0x4] ss:$16 sps:$4 sm:$0xff]   ;;  %v536_v34 = vld [vmem:[%s682_s0 + $0x8] ss:$16 sps:$4 sm:$0xff]  }
   0xe   :  { %485 = vmatprep.subr.bf16.mxu1 %v514_v13  ;;  %v538_v35 = vld [vmem:[%s682_s0 + $0xc] ss:$16 sps:$4 sm:$0xff]   ;;  %337 = vmatprep.mubr.bf16.mxu0 %v535_v33 }
   0xf   :  { %378 = vmatprep.mubr.bf16.mxu1 %v538_v35 }
  0x10   :  { %464 = vmatpush3.bf16.msra.mxu0 %v515_v14 }
  0x11   :  { %486 = vmatpush3.bf16.msra.mxu1 %v516_v15  ;;  %465 = vmatprep.subr.bf16.mxu0 %v517_v16 }
  0x12   :  { %487 = vmatprep.subr.bf16.mxu1 %v518_v17 }
  0x14   :  { %466 = vmatpush3.bf16.msra.mxu0 %v519_v18 }
  0x15   :  { %488 = vmatpush3.bf16.msra.mxu1 %v520_v19  ;;  %467 = vmatprep.subr.bf16.mxu0 %v521_v20 }
  0x16   :  { %489 = vmatprep.subr.bf16.mxu1 %v522_v21 }
  0x18   :  { %468 = vmatpush3.bf16.msra.mxu0 %v523_v22 }
  0x19   :  { %490 = vmatpush3.bf16.msra.mxu1 %v524_v23  ;;  %469 = vmatprep.subr.bf16.mxu0 %v525_v24 }
  0x1a   :  { %491 = vmatprep.subr.bf16.mxu1 %v526_v25 }
  0x1c   :  { %470 = vmatpush3.bf16.msra.mxu0 %v527_v26 }
  0x1d   :  { %492 = vmatpush3.bf16.msra.mxu1 %v528_v27  ;;  %471 = vmatprep.subr.bf16.mxu0 %v529_v28 }
  0x1e   :  { %493 = vmatprep.subr.bf16.mxu1 %v530_v29 }
  0x20   :  { %472 = vmatpush3.bf16.msra.mxu0 %v531_v30 }
  0x21   :  { %494 = vmatpush3.bf16.msra.mxu1 %v532_v31 }
  0x23   :  { %338 = vmatmul.mubr.bf16.vlgmr.msra.gmra.mrb[0].mxu0 %v533_v32 }
  0x24   :  { %379 = vmatmul.mubr.bf16.vlgmr.msra.gmra.mrb[0].mxu1 %v536_v34 }
  0xf6   :  { %v473_v36 = vpop.f32.mrb[0].mxu0 }
  0xf7   :  { %v495_v37 = vpop.f32.mrb[0].mxu1  ;;  %v474_v39 = vpop.f32.mrb[1].mxu0 }
  0xf8   :  { %v475_v40 = vadd.f32 %v474_v39, %v473_v36  ;;  %v496_v41 = vpop.f32.mrb[1].mxu1  ;;  %v476_v42 = vpop.f32.mrb[2].mxu0 }
  0xf9   :  { %v497_v43 = vadd.f32 %v496_v41, %v495_v37  ;;  %v498_v45 = vpop.f32.mrb[2].mxu1  ;;  %v477_v46 = vpop.f32.mrb[3].mxu0 }
  0xfa   :  { %v340_v47 = vadd.f32 %v475_v40, %v407_v38  ;;  %v478_v48 = vadd.f32 %v477_v46, %v476_v42  ;;  %v499_v49 = vpop.f32.mrb[3].mxu1 }
  0xfb   :  { %v500_v50 = vadd.f32 %v499_v49, %v498_v45 }
  0xfc   :  { %v381_v51 = vadd.f32 %v497_v43, %v340_v47  ;;  %v343_v53 = vadd.f32 %v478_v48, %v407_v38 }
  0xfe   :  { %v384_v55 = vadd.f32 %v500_v50, %v343_v53  ;;  %v391_v56 = vadd.f32 %v450_v52, %v381_v51 }
 0x100   :  { %v392_v57 = vadd.f32 %v451_v54, %v384_v55 }
 0x102   :  { %v455_v58 = vpack.c.bf16 %v392_v57, %v391_v56 }
 0x104   :  { %456 = vst [vmem:[%s685_s4] sm:$0xff] %v455_v58  }

// kernel: vit2_forward.16
= control target key start
LH: loop header
LB: loop body
LE: loop exit
PB: predicated region body
PF: predicated region fallthrough
CT: control target
= control target key end

     0   :  { %v560_v37 = vmov 0   ;;  %v107_v61 = vlaneseq  ;;  %s721_s0 = inlined_call_operand.vmem [shape: bf16[16,128], index: 0, kind: input, shape index: {}]   ;;  %s722_s3 = inlined_call_operand.vmem [shape: bf16[128,512], index: 3, kind: input, shape index: {}]   ;;  %s723_s1 = inlined_call_operand.vmem [shape: f32[1,128], index: 1, kind: input, shape index: {}]   ;;  %s724_s2 = inlined_call_operand.vmem [shape: f32[1,128], index: 2, kind: input, shape index: {}]   ;;  %s725_s4 = inlined_call_operand.vmem [shape: f32[1,512], index: 4, kind: input, shape index: {}]   ;;  %s726_s5 = inlined_call_operand.vmem [shape: bf16[16,512], index: 5, kind: output, shape index: {}]  }
   0x1   :  { %v488_v0 = vld [vmem:[%s721_s0] sm:$0xff]   ;;  %v494_v4 = vld [vmem:[%s722_s3 + $0xc] ss:$16 sps:$4 sm:$0xff]   ;;  %v497_v6 = vld [vmem:[%s722_s3 + $0x8] ss:$16 sps:$4 sm:$0xff]   ;;  %319 = vmatprep.mubr.bf16.mxu0 %v560_v37  ;;  %362 = vmatprep.mubr.bf16.mxu1 %v560_v37 }
   0x2   :  { %v489_v1 = vunpack.c.l.bf16 %v488_v0  ;;  %v490_v2 = vunpack.c.h.bf16 %v488_v0  ;;  %v492_v3 = vld [vmem:[%s722_s3 + $0x4] ss:$16 sps:$4 sm:$0xff]   ;;  %v496_v5 = vld [vmem:[%s722_s3] ss:$16 sps:$4 sm:$0xff]   ;;  %330 = vmatprep.subr.bf16.mxu1 %v494_v4  ;;  %v500_v8 = vld [vmem:[%s722_s3 + $0x2c] ss:$16 sps:$4 sm:$0xff]  }
   0x3   :  { %287 = vmatprep.subr.bf16.mxu0 %v492_v3  ;;  %v498_v7 = vld [vmem:[%s722_s3 + $0x24] ss:$16 sps:$4 sm:$0xff]   ;;  %331 = vmatpush1.bf16.msra.mxu1 %v497_v6  ;;  %v502_v17 = vld [vmem:[%s722_s3 + $0x20] ss:$16 sps:$4 sm:$0xff]   ;;  %v503_v18 = vld [vmem:[%s722_s3 + $0x28] ss:$16 sps:$4 sm:$0xff]  }
   0x4   :  { %29 = vadd.xlane.f32.xlu0 %v489_v1  ;;  %288 = vmatpush1.bf16.msra.mxu0 %v496_v5  ;;  %v504_v19 = vld [vmem:[%s722_s3 + $0x44] ss:$16 sps:$4 sm:$0xff]   ;;  %v506_v20 = vld [vmem:[%s722_s3 + $0x4c] ss:$16 sps:$4 sm:$0xff]   ;;  %v508_v21 = vld [vmem:[%s722_s3 + $0x40] ss:$16 sps:$4 sm:$0xff]  }
   0x5   :  { %289 = vmatprep.subr.bf16.mxu0 %v498_v7  ;;  %332 = vmatprep.subr.bf16.mxu1 %v500_v8  ;;  %v509_v22 = vld [vmem:[%s722_s3 + $0x48] ss:$16 sps:$4 sm:$0xff]   ;;  %v510_v23 = vld [vmem:[%s722_s3 + $0x64] ss:$16 sps:$4 sm:$0xff]   ;;  %v512_v24 = vld [vmem:[%s722_s3 + $0x6c] ss:$16 sps:$4 sm:$0xff]  }
   0x6   :  { %v514_v25 = vld [vmem:[%s722_s3 + $0x60] ss:$16 sps:$4 sm:$0xff]   ;;  %v515_v26 = vld [vmem:[%s722_s3 + $0x68] ss:$16 sps:$4 sm:$0xff]   ;;  %v516_v27 = vld [vmem:[%s722_s3 + $0x84] ss:$16 sps:$4 sm:$0xff]  }
   0x7   :  { %333 = vmatpush1.bf16.msra.mxu1 %v503_v18  ;;  %v518_v28 = vld [vmem:[%s722_s3 + $0x8c] ss:$16 sps:$4 sm:$0xff]   ;;  %v520_v29 = vld [vmem:[%s722_s3 + $0x80] ss:$16 sps:$4 sm:$0xff]   ;;  %v521_v30 = vld [vmem:[%s722_s3 + $0x88] ss:$16 sps:$4 sm:$0xff]  }
   0x8   :  { %31 = vadd.xlane.f32.xlu0 %v490_v2  ;;  %290 = vmatpush1.bf16.msra.mxu0 %v502_v17  ;;  %v522_v31 = vld [vmem:[%s722_s3 + $0xa4] ss:$16 sps:$4 sm:$0xff]   ;;  %v524_v32 = vld [vmem:[%s722_s3 + $0xac] ss:$16 sps:$4 sm:$0xff]   ;;  %v526_v33 = vld [vmem:[%s722_s3 + $0xa0] ss:$16 sps:$4 sm:$0xff]  }
   0x9   :  { %291 = vmatprep.subr.bf16.mxu0 %v504_v19  ;;  %334 = vmatprep.subr.bf16.mxu1 %v506_v20  ;;  %v527_v34 = vld [vmem:[%s722_s3 + $0xa8] ss:$16 sps:$4 sm:$0xff]   ;;  %v528_v35 = vld [vmem:[%s722_s3 + $0xc4] ss:$16 sps:$4 sm:$0xff]   ;;  %v530_v36 = vld [vmem:[%s722_s3 + $0xcc] ss:$16 sps:$4 sm:$0xff]  }
   0xa   :  { %v532_v38 = vld [vmem:[%s722_s3 + $0xc0] ss:$16 sps:$4 sm:$0xff]   ;;  %v533_v39 = vld [vmem:[%s722_s3 + $0xc8] ss:$16 sps:$4 sm:$0xff]   ;;  %v534_v40 = vld [vmem:[%s722_s3 + $0xe4] ss:$16 sps:$4 sm:$0xff]  }
   0xb   :  { %335 = vmatpush1.bf16.msra.mxu1 %v509_v22  ;;  %v536_v41 = vld [vmem:[%s722_s3 + $0xec] ss:$16 sps:$4 sm:$0xff]   ;;  %v538_v42 = vld [vmem:[%s722_s3 + $0xe0] ss:$16 sps:$4 sm:$0xff]   ;;  %v539_v43 = vld [vmem:[%s722_s3 + $0xe8] ss:$16 sps:$4 sm:$0xff]  }
   0xc   :  { %292 = vmatpush1.bf16.msra.mxu0 %v508_v21  ;;  %336 = vmatprep.subr.bf16.mxu1 %v512_v24  ;;  %v445_v52 = vld [vmem:[%s723_s1] ss:$0 sm:$0xff]  ;;  %v108_v62 = vshrl.u32 %v107_v61, 7 }
   0xd   :  { %293 = vmatprep.subr.bf16.mxu0 %v510_v23  ;;  %v446_v56 = vld [vmem:[%s724_s2] ss:$0 sm:$0xff] }
   0xe   :  { %v109_v63 = vsub.s32 0, %v108_v62  ;;  %v117_v0 = vsub.s32 2, %v108_v62  ;;  %v121_v3 = vsub.s32 3, %v108_v62 }
   0xf   :  { %337 = vmatpush1.bf16.msra.mxu1 %v515_v26 }
  0x10   :  { %294 = vmatpush1.bf16.msra.mxu0 %v514_v25  ;;  %338 = vmatprep.subr.bf16.mxu1 %v518_v28 }
  0x11   :  { %295 = vmatprep.subr.bf16.mxu0 %v516_v27 }
  0x13   :  { %339 = vmatpush1.bf16.msra.mxu1 %v521_v30 }
  0x14   :  { %296 = vmatpush1.bf16.msra.mxu0 %v520_v29  ;;  %340 = vmatprep.subr.bf16.mxu1 %v524_v32 }
  0x15   :  { %297 = vmatprep.subr.bf16.mxu0 %v522_v31 }
  0x17   :  { %341 = vmatpush1.bf16.msra.mxu1 %v527_v34 }
  0x18   :  { %298 = vmatpush1.bf16.msra.mxu0 %v526_v33  ;;  %342 = vmatprep.subr.bf16.mxu1 %v530_v36 }
  0x19   :  { %299 = vmatprep.subr.bf16.mxu0 %v528_v35 }
  0x1b   :  { %343 = vmatpush1.bf16.msra.mxu1 %v533_v39 }
  0x1c   :  { %300 = vmatpush1.bf16.msra.mxu0 %v532_v38  ;;  %344 = vmatprep.subr.bf16.mxu1 %v536_v41 }
  0x1d   :  { %301 = vmatprep.subr.bf16.mxu0 %v534_v40 }
  0x1f   :  { %345 = vmatpush1.bf16.msra.mxu1 %v539_v43 }
  0x20   :  { %302 = vmatpush1.bf16.msra.mxu0 %v538_v42 }
  0x91   :  { %v30_v9 = vpop.xlane.xlu0 %29 }
  0x92   :  { %v34_v10 = vmul.f32 0.0078125, %v30_v9 }
  0x94   :  { %v612_v11 = vsub.f32 %v489_v1, %v34_v10  ;;  %v105_v1 = vld [vmem:[%s725_s4] sm:$0xf] }
  0x95   :  { %v32_v12 = vpop.xlane.xlu0 %31  ;;  %v110_v4 = vrot.slane %v105_v1, %v109_v63  ;;  %v118_v5 = vrot.slane %v105_v1, %v117_v0  ;;  %v122_v7 = vrot.slane %v105_v1, %v121_v3 }
  0x96   :  { %v35_v13 = vmul.f32 0.0078125, %v32_v12  ;;  %v38_v14 = vmul.f32 %v612_v11, %v612_v11 }
  0x98   :  { %v616_v15 = vsub.f32 %v490_v2, %v35_v13  ;;  %40 = vadd.xlane.f32.xlu1 %v38_v14  ;;  %v113_v2 = vsub.s32 1, %v108_v62 }
  0x9a   :  { %v39_v16 = vmul.f32 %v616_v15, %v616_v15  ;;  %v114_v6 = vrot.slane %v105_v1, %v113_v2 }
  0x9c   :  { %42 = vadd.xlane.f32.xlu1 %v39_v16 }
 0x125   :  { %v41_v44 = vpop.xlane.xlu1 %40 }
 0x126   :  { %v44_v45 = vmul.f32 0.0078125, %v41_v44 }
 0x128   :  { %v46_v46 = vadd.f32 1e-06, %v44_v45 }
 0x129   :  { %v43_v47 = vpop.xlane.xlu1 %42 }
 0x12a   :  { %540 = vrsqrt.f32 %v46_v46  ;;  %v45_v48 = vmul.f32 0.0078125, %v43_v47 }
 0x12c   :  { %v47_v49 = vadd.f32 1e-06, %v45_v48 }
 0x12e   :  { %542 = vrsqrt.f32 %v47_v49 }
 0x134   :  { %v541_v50 = vpop.eup %540 }
 0x135   :  { %v50_v51 = vmul.f32 %v541_v50, %v612_v11 }
 0x137   :  { %v59_v55 = vmul.f32 %v445_v52, %v50_v51 }
 0x138   :  { %v543_v53 = vpop.eup %542 }
 0x139   :  { %v51_v54 = vmul.f32 %v543_v53, %v616_v15  ;;  %v68_v58 = vadd.f32 %v446_v56, %v59_v55 }
 0x13b   :  { %v60_v57 = vmul.f32 %v445_v52, %v51_v54 }
 0x13d   :  { %v69_v59 = vadd.f32 %v446_v56, %v60_v57 }
 0x13f   :  { %v70_v60 = vpack.c.bf16 %v69_v59, %v68_v58 }
 0x141   :  { %320 = vmatmul.mubr.bf16.vlgmr.msra.gmra.mrb[0].mxu0 %v70_v60  ;;  %363 = vmatmul.mubr.bf16.vlgmr.msra.gmra.mrb[0].mxu1 %v70_v60 }
 0x214   :  { %v321_v8 = vpop.f32.mrb[0].mxu0  ;;  %v364_v9 = vpop.f32.mrb[0].mxu1 }
 0x215   :  { %v322_v10 = vadd.f32 %v321_v8, %v110_v4  ;;  %v365_v11 = vadd.f32 %v364_v9, %v118_v5  ;;  %v323_v12 = vpop.f32.mrb[1].mxu0  ;;  %v366_v13 = vpop.f32.mrb[1].mxu1 }
 0x216   :  { %v324_v14 = vadd.f32 %v323_v12, %v114_v6  ;;  %v367_v15 = vadd.f32 %v366_v13, %v122_v7  ;;  %v325_v16 = vpop.f32.mrb[2].mxu0  ;;  %v368_v17 = vpop.f32.mrb[2].mxu1 }
 0x217   :  { %v381_v18 = vmul.f32 0.70710677, %v322_v10  ;;  %v383_v19 = vmul.f32 0.70710677, %v365_v11  ;;  %v326_v22 = vadd.f32 %v325_v16, %v110_v4  ;;  %v369_v23 = vadd.f32 %v368_v17, %v118_v5  ;;  %v327_v24 = vpop.f32.mrb[3].mxu0  ;;  %v370_v25 = vpop.f32.mrb[3].mxu1 }
 0x218   :  { %v382_v20 = vmul.f32 0.70710677, %v324_v14  ;;  %v384_v21 = vmul.f32 0.70710677, %v367_v15  ;;  %v328_v26 = vadd.f32 %v327_v24, %v114_v6  ;;  %v371_v27 = vadd.f32 %v370_v25, %v122_v7 }
 0x219   :  { %544 = verf.f32 %v381_v18  ;;  %v385_v28 = vmul.f32 0.70710677, %v326_v22  ;;  %v387_v29 = vmul.f32 0.70710677, %v369_v23  ;;  %v373_v34 = vmul.f32 0.5, %v322_v10 }
 0x21a   :  { %546 = verf.f32 %v383_v19  ;;  %v386_v30 = vmul.f32 0.70710677, %v328_v26  ;;  %v388_v31 = vmul.f32 0.70710677, %v371_v27  ;;  %v375_v37 = vmul.f32 0.5, %v365_v11 }
 0x21b   :  { %548 = verf.f32 %v382_v20  ;;  %v374_v41 = vmul.f32 0.5, %v324_v14  ;;  %v376_v45 = vmul.f32 0.5, %v367_v15  ;;  %v377_v49 = vmul.f32 0.5, %v326_v22 }
 0x21c   :  { %550 = verf.f32 %v384_v21  ;;  %v379_v53 = vmul.f32 0.5, %v369_v23  ;;  %v378_v58 = vmul.f32 0.5, %v328_v26  ;;  %v380_v62 = vmul.f32 0.5, %v371_v27 }
 0x21d   :  { %552 = verf.f32 %v385_v28 }
 0x21e   :  { %554 = verf.f32 %v387_v29 }
 0x21f   :  { %556 = verf.f32 %v386_v30 }
 0x220   :  { %558 = verf.f32 %v388_v31 }
 0x223   :  { %v545_v32 = vpop.eup %544 }
 0x224   :  { %v547_v33 = vpop.eup %546  ;;  %v397_v35 = vadd.f32 1.0, %v545_v32 }
 0x225   :  { %v549_v36 = vpop.eup %548  ;;  %v399_v38 = vadd.f32 1.0, %v547_v33 }
 0x226   :  { %v551_v39 = vpop.eup %550  ;;  %v405_v40 = vmul.f32 %v397_v35, %v373_v34  ;;  %v398_v42 = vadd.f32 1.0, %v549_v36 }
 0x227   :  { %v553_v43 = vpop.eup %552  ;;  %v407_v44 = vmul.f32 %v399_v38, %v375_v37  ;;  %v400_v46 = vadd.f32 1.0, %v551_v39 }
 0x228   :  { %v555_v47 = vpop.eup %554  ;;  %v406_v48 = vmul.f32 %v398_v42, %v374_v41  ;;  %v401_v50 = vadd.f32 1.0, %v553_v43 }
 0x229   :  { %v557_v51 = vpop.eup %556  ;;  %v408_v52 = vmul.f32 %v400_v46, %v376_v45  ;;  %v403_v54 = vadd.f32 1.0, %v555_v47 }
 0x22a   :  { %v559_v55 = vpop.eup %558  ;;  %v483_v56 = vpack.c.bf16 %v406_v48, %v405_v40  ;;  %v409_v57 = vmul.f32 %v401_v50, %v377_v49  ;;  %v402_v59 = vadd.f32 1.0, %v557_v51 }
 0x22b   :  { %v484_v60 = vpack.c.bf16 %v408_v52, %v407_v44  ;;  %v411_v61 = vmul.f32 %v403_v54, %v379_v53  ;;  %v404_v63 = vadd.f32 1.0, %v559_v55 }
 0x22c   :  { %437 = vst [vmem:[%s726_s5] sm:$0xff] %v483_v56  ;;  %v410_v0 = vmul.f32 %v402_v59, %v378_v58 }
 0x22d   :  { %438 = vst [vmem:[%s726_s5 + $0x8] sm:$0xff] %v484_v60  ;;  %v412_v1 = vmul.f32 %v404_v63, %v380_v62 }
 0x22e   :  { %v485_v2 = vpack.c.bf16 %v410_v0, %v409_v57 }
 0x22f   :  { %v486_v3 = vpack.c.bf16 %v412_v1, %v411_v61 }
 0x230   :  { %439 = vst [vmem:[%s726_s5 + $0x10] sm:$0xff] %v485_v2 }
 0x231   :  { %440 = vst [vmem:[%s726_s5 + $0x18] sm:$0xff] %v486_v3 }

// kernel: vit2_forward.23
= control target key start
LH: loop header
LB: loop body
LE: loop exit
PB: predicated region body
PF: predicated region fallthrough
CT: control target
= control target key end

     0   :  { %vm28_vm0 = vcmask 1041408   ;;  %s349_s0 = inlined_call_operand.vmem [shape: bf16[2,128], index: 0, kind: input, shape index: {}]   ;;  %s350_s1 = inlined_call_operand.vmem [shape: f32[1,128], index: 1, kind: input, shape index: {}]   ;;  %s351_s2 = inlined_call_operand.vmem [shape: f32[1,128], index: 2, kind: input, shape index: {}]   ;;  %s352_s3 = inlined_call_operand.vmem [shape: bf16[128,128], index: 3, kind: input, shape index: {}]   ;;  %s353_s4 = inlined_call_operand.vmem [shape: f32[1,128], index: 4, kind: input, shape index: {}]   ;;  %s354_s5 = inlined_call_operand.hbm [shape: f32[2,128], index: 5, kind: output, shape index: {}]  }
   0x1   :  { %v26_v0 = vld [vmem:[%s349_s0] sm:$0x1] }
   0x2   :  { %v27_v1 = vunpack.c.l.bf16 %v26_v0 }
   0x4   :  { %v29_v2 = vsel %vm28_vm0, %v27_v1, 0.0 }
   0x5   :  { %30 = vadd.xlane.f32.xlu0 %v29_v2 }
   0x6   :  { %10 = vsyncpa [#allocation4], 0  ;;  %v268_v3 = vmov 0.0   ;;  %v232_v9 = vld [vmem:[%s352_s3] sm:$0xff]   ;;  %v233_v10 = vld [vmem:[%s352_s3 + $0x8] sm:$0xff]   ;;  %vm269_vm1 = vmmov 0  }
   0x7   :  { %209 = vmatprep.subr.bf16.mxu0 %v268_v3  ;;  %v234_v11 = vld [vmem:[%s352_s3 + $0x10] sm:$0xff]   ;;  %v235_v12 = vld [vmem:[%s352_s3 + $0x18] sm:$0xff]   ;;  %v236_v13 = vld [vmem:[%s352_s3 + $0x20] sm:$0xff]   ;;  %225 = vmatprep.mubr.msk.bf16.mxu0 %vm269_vm1, %v268_v3 }
   0x8   :  { %210 = vmatpush3.bf16.msra.mxu0 %v232_v9  ;;  %v237_v14 = vld [vmem:[%s352_s3 + $0x28] sm:$0xff]   ;;  %v238_v15 = vld [vmem:[%s352_s3 + $0x30] sm:$0xff]   ;;  %v239_v16 = vld [vmem:[%s352_s3 + $0x38] sm:$0xff]  }
   0x9   :  { %211 = vmatprep.subr.bf16.mxu0 %v268_v3  ;;  %v189_v21 = vld [vmem:[%s350_s1] ss:$0 sm:$0xff]  ;;  %s270_s1 = smov [#allocation3]  }
   0xa   :  { %v190_v23 = vld [vmem:[%s351_s2] ss:$0 sm:$0xff]  ;;  %s181_s15 = sshll.u32 %s270_s1, 4  ;;  %s182_s15 = int_to_ptr.vmem [resolvable:$true] %s181_s15 }
   0xb   :  { %v191_v28 = vld [vmem:[%s353_s4] ss:$0 sm:$0xff]  ;;  %s244_s2 = scalar_lea.vmem %s182_s15, 32  ;;  %p249_p1 = scmp.lt.s32.totalorder %s182_s15, %s182_s15 }
   0xc   :  { %212 = vmatpush3.bf16.msra.mxu0 %v233_v10  ;;  %p245_p0 = scmp.ne.s32.totalorder %s182_s15, %s244_s2  ;;  %p250_p2 = scmp.lt.s32.totalorder %s244_s2, %s244_s2 }
   0xd   :  { %213 = vmatprep.subr.bf16.mxu0 %v268_v3 }
   0xe   :  { %p251_p3 = por %p250_p2, %p249_p1 }
  0x10   :  { %214 = vmatpush3.bf16.msra.mxu0 %v234_v11  ;;  %p252_p4 = pnand %p251_p3, %p245_p0 }
  0x11   :  { %215 = vmatprep.subr.bf16.mxu0 %v268_v3 }
  0x14   :  { %216 = vmatpush3.bf16.msra.mxu0 %v235_v12 }
  0x15   :  { %217 = vmatprep.subr.bf16.mxu0 %v268_v3 }
  0x18   :  { %218 = vmatpush3.bf16.msra.mxu0 %v236_v13 }
  0x19   :  { %219 = vmatprep.subr.bf16.mxu0 %v268_v3 }
  0x1c   :  { %220 = vmatpush3.bf16.msra.mxu0 %v237_v14 }
  0x1d   :  { %221 = vmatprep.subr.bf16.mxu0 %v268_v3 }
  0x20   :  { %222 = vmatpush3.bf16.msra.mxu0 %v238_v15 }
  0x21   :  { %223 = vmatprep.subr.bf16.mxu0 %v268_v3 }
  0x24   :  { %224 = vmatpush3.bf16.msra.mxu0 %v239_v16 }
  0x92   :  { %v31_v4 = vpop.xlane.xlu0 %30 }
  0x93   :  { %v33_v5 = vmul.f32 0.0078125, %v31_v4 }
  0x95   :  { %v34_v6 = vsub.f32 %v27_v1, %v33_v5 }
  0x97   :  { %v35_v7 = vmul.f32 %v34_v6, %v34_v6 }
  0x99   :  { %v36_v8 = vsel %vm28_vm0, %v35_v7, 0.0 }
  0x9a   :  { %37 = vadd.xlane.f32.xlu0 %v36_v8 }
 0x127   :  { %v38_v17 = vpop.xlane.xlu0 %37 }
 0x128   :  { %v39_v18 = vmul.f32 0.0078125, %v38_v17 }
 0x12a   :  { %v40_v19 = vadd.f32 1e-06, %v39_v18 }
 0x12c   :  { %240 = vrsqrt.f32 %v40_v19 }
 0x136   :  { %v241_v20 = vpop.eup %240 }
 0x137   :  { %v42_v22 = vmul.f32 %v241_v20, %v34_v6 }
 0x139   :  { %v50_v24 = vmul.f32 %v189_v21, %v42_v22 }
 0x13b   :  { %v58_v25 = vadd.f32 %v190_v23, %v50_v24 }
 0x13d   :  { %v59_v26 = vpack.c.bf16 %v58_v25, %v58_v25 }
 0x13f   :  { %60 = vst [vmem:[#allocation2] sm:$0x1] %v59_v26 }
 0x146   :  { %v61_v27 = vld [vmem:[#allocation2] sm:$0x1] }
 0x147   :  { %226 = vmatmul.mubr.bf16.vlgmr.msra.gmra.mrb[0].mxu0 %v61_v27 }
 0x21a   :  { %v167_v29 = vpop.f32.mrb[0].mxu0 }
 0x21b   :  { %v168_v30 = vadd.f32 %v191_v28, %v167_v29  ;;  %v227_v31 = vpop.f32.mrb[1].mxu0 }
 0x21c   :  { %v170_v32 = vpop.f32.mrb[2].mxu0 }
 0x21d   :  { %242 = vtanh.f32 %v168_v30  ;;  %v228_v33 = vpop.f32.mrb[3].mxu0 }
 0x227   :  { %v243_v34 = vpop.eup %242 }
 0x228   :  { %174 = vst [vmem:[#allocation3] sm:$0x3] %v243_v34 }
 0x229   :  { %255 = shalt.err (!%p252_p4)
}
 0x22a   :  { %s256_s17 = scalar_lea.hbm %s354_s5, 32 }
 0x22b   :  { %p257_p5 = scmp.ne.s32.totalorder %s354_s5, %s256_s17  ;;  %p260_p6 = scmp.lt.u32.totalorder %s256_s17, %s354_s5 }
 0x22d   :  { %p262_p7 = pnand %p260_p6, %p257_p5 }
 0x22f   :  { %265 = shalt.err (!%p262_p7)
}
 0x230   :  { %184 = dma.vmem_to_hbm [thread:$0]  %s182_s15, 32, %s354_s5, [#allocation4]  }
 0x231   :  { %266 = dma.done.wait [#allocation4], 32  }
 0x232   :  { %267 = vsyncadd [#allocation4], 4294967264 }
 0x233   :  { %188 = vsyncpa [#allocation4], 1 }

</bundles_post_ra>
